<compile_context>
chip_gen: v7x
topology: tpu7x:2x2x1
jax: 0.10.0
libtpu: 0.0.40
codegen_flags: <defaults>
</compile_context>

<pallas_src>
import functools

import jax
import jax.numpy as jnp
from jax.experimental import pallas as pl
from jax.experimental.pallas import tpu as pltpu

# ----------------------------- configuration -------------------------------
EMBED_DIM = 32
NUM_CLASSES = 10
NUM_HEADS = 2
N_UNSUP = 8
N_CONCEPTS = 8
N_SPATIAL = 8          # TODO(synk): branch batching assumes equal slot counts.
NUM_ITERS = 1
LN_EPS = 1e-5
SLOT_EPS = 1e-8

SA_KEYS = ("ln_in_g", "ln_in_b", "wkv", "wq", "ln_slots_g", "ln_slots_b",
           "gru_w", "gru_b", "ln_mlp_g", "ln_mlp_b",
           "mlp_w1", "mlp_b1", "mlp_w2", "mlp_b2")
CT_KEYS = ("wq_h", "wk_h", "wvp_h", "proj_b")


# ------------------------------ fused kernel --------------------------------
def _dot_nt(a, b):
    """a @ b.T (NT contraction, MXU-native, no explicit transpose)."""
    return jax.lax.dot_general(a, b, (((1,), (1,)), ((), ())),
                               preferred_element_type=jnp.float32)


def _ln(v, g, b):
    mu = jnp.mean(v, axis=-1, keepdims=True)
    var = jnp.mean(jnp.square(v - mu), axis=-1, keepdims=True)
    return (v - mu) * jax.lax.rsqrt(var + LN_EPS) * g + b


def _ctc_kernel(
    x_ref, slots_init_ref,
    ln_in_g_ref, ln_in_b_ref, wkv_ref, wq_ref,
    ln_slots_g_ref, ln_slots_b_ref, gru_w_ref, gru_b_ref,
    ln_mlp_g_ref, ln_mlp_b_ref, mlp_w1_ref, mlp_b1_ref, mlp_w2_ref, mlp_b2_ref,
    slot_pos_ref,
    ct_wq_ref, ct_wk_ref, ct_wvp_ref, ct_pb_ref,
    out_ref, attn_ref,
    *, N, S, D, H, NC, num_iters,
):
    """One (branch, batch-item) grid step: slot attention + cross attention."""
    f32 = jnp.float32

    x = x_ref[0].astype(f32)                                       # (N, D)

    # -------------------- ConceptQuerySlotAttention --------------------
    feats = _ln(x, ln_in_g_ref[0], ln_in_b_ref[0])
    kv = jnp.dot(feats, wkv_ref[0], preferred_element_type=f32)    # (N, 2D)
    k = kv[:, :D]
    v = kv[:, D:]

    slots = slots_init_ref[0, 0].astype(f32)                       # (S, D)

    for _ in range(num_iters):
        slots_prev = slots
        s_norm = _ln(slots, ln_slots_g_ref[0], ln_slots_b_ref[0])
        # qk scale (D**-0.5) is folded into wq at init time.
        q = jnp.dot(s_norm, wq_ref[0], preferred_element_type=f32)  # (S, D)

        logits = _dot_nt(q, k)                                      # (S, N)
        # softmax over the SLOT axis (slots compete for tokens)
        m = jnp.max(logits, axis=0, keepdims=True)
        e = jnp.exp(logits - m)
        attn = e / jnp.sum(e, axis=0, keepdims=True)
        w = attn + SLOT_EPS
        w = w / jnp.sum(w, axis=1, keepdims=True)                   # weighted mean
        updates = jnp.dot(w, v, preferred_element_type=f32)         # (S, D)

        # GRUCell — single merged matmul.  Packed weight columns are
        # [r | z | n_input | n_hidden] so the n-gate (gi_n + r*gh_n) stays exact.
        cat = jnp.concatenate([updates, slots_prev], axis=-1)       # (S, 2D)
        gates = jnp.dot(cat, gru_w_ref[0],
                        preferred_element_type=f32) + gru_b_ref[0]  # (S, 4D)
        r = jax.nn.sigmoid(gates[:, :D])
        z = jax.nn.sigmoid(gates[:, D:2 * D])
        n = jnp.tanh(gates[:, 2 * D:3 * D] + r * gates[:, 3 * D:])
        slots_new = (1.0 - z) * n + z * slots_prev

        # MLP + residual
        m2 = _ln(slots_new, ln_mlp_g_ref[0], ln_mlp_b_ref[0])
        hid = jnp.maximum(
            jnp.dot(m2, mlp_w1_ref[0], preferred_element_type=f32)
            + mlp_b1_ref[0], 0.0)
        slots = slots_new + jnp.dot(hid, mlp_w2_ref[0],
                                    preferred_element_type=f32) + mlp_b2_ref[0]

    # ---- slot positional embedding (broadcast add; spatial branch = zeros) ----
    y = slots + slot_pos_ref[0].astype(f32)                         # (S, D)

    # ------------------------- CrossAttention --------------------------
    # Per-head weights are pre-split on the host (no 16-lane slices here);
    # the attention scale is folded into ct_wq_h, and wv_h @ proj_w_h is
    # pre-folded into ct_wvp_h.  Classifier output uses
    # mean_N(a_h @ v_h @ P_h) = (mean_N a_h) @ (v_h @ P_h)  (exact).
    # TODO(synk): reference CrossAttention uses scale = dim**-0.5 (full embed
    # dim), not head_dim**-0.5 — reproduced verbatim (folded into ct_wq_h).
    attn_acc = jnp.zeros((N, S), f32)
    out_acc = jnp.zeros((1, NC), f32)
    for h in range(H):                                              # H = 2, unrolled
        qh = jnp.dot(x, ct_wq_ref[0, h], preferred_element_type=f32)   # (N, Dh)
        kh = jnp.dot(y, ct_wk_ref[0, h], preferred_element_type=f32)   # (S, Dh)
        vph = jnp.dot(y, ct_wvp_ref[0, h], preferred_element_type=f32) # (S, NC)
        lg = _dot_nt(qh, kh)                                            # (N, S)
        mx = jnp.max(lg, axis=-1, keepdims=True)
        e = jnp.exp(lg - mx)
        a = e / jnp.sum(e, axis=-1, keepdims=True)                      # softmax over slots
        attn_acc = attn_acc + a
        tok_mean = jnp.mean(a, axis=0, keepdims=True)                   # (1, S)
        out_acc = out_acc + jnp.dot(tok_mean, vph,
                                    preferred_element_type=f32)         # (1, NC)

    out_ref[0, 0] = (out_acc + ct_pb_ref[0]).astype(out_ref.dtype)      # (1, NC)
    attn_ref[0, 0] = (attn_acc * (1.0 / H)).astype(attn_ref.dtype)      # (N, S)


# --------------------------- model-level forward ----------------------------
def ctc_swin_qsa_forward(params, x, key, sigma=0.0):
    B, N, D = x.shape
    S = params["slots_init"].shape[-2]
    H = params["ct"]["wq_h"].shape[1]
    NC = params["ct"]["proj_b"].shape[-1]

    # Slot initializations for the three branches (unsup has no noise;
    # concept/spatial use the reference's multiplicative noise mu + z*sigma*mu).
    k1, k2 = jax.random.split(key)
    unsup_init = jnp.broadcast_to(params["slots_init"][0][None], (B, S, D))
    mu_c = jnp.broadcast_to(params["slots_init"][1][None], (B, S, D))
    concept_init = mu_c + jax.random.normal(k1, mu_c.shape, mu_c.dtype) * sigma * mu_c
    mu_s = jnp.broadcast_to(params["slots_init"][2][None], (B, S, D))
    spatial_init = mu_s + jax.random.normal(k2, mu_s.shape, mu_s.dtype) * sigma * mu_s
    slots_init_all = jnp.stack([unsup_init, concept_init, spatial_init], axis=0)  # (3,B,S,D)

    inputs = [x, slots_init_all]
    inputs += [params["sa"][k] for k in SA_KEYS]
    inputs += [params["slot_pos"]]
    inputs += [params["ct"][k] for k in CT_KEYS]

    def branch_spec(a):
        nd = a.ndim
        return pl.BlockSpec((1,) + a.shape[1:],
                            lambda g, b, _nd=nd: (g,) + (0,) * (_nd - 1))

    in_specs = [pl.BlockSpec((1, N, D), lambda g, b: (b, 0, 0)),
                pl.BlockSpec((1, 1, S, D), lambda g, b: (g, b, 0, 0))]
    in_specs += [branch_spec(a) for a in inputs[2:]]

    kernel = functools.partial(_ctc_kernel, N=N, S=S, D=D, H=H, NC=NC,
                               num_iters=NUM_ITERS)

    out_mean, attn = pl.pallas_call(
        kernel,
        out_shape=(jax.ShapeDtypeStruct((3, B, 1, NC), x.dtype),
                   jax.ShapeDtypeStruct((3, B, N, S), x.dtype)),
        grid=(3, B),
        in_specs=in_specs,
        out_specs=(pl.BlockSpec((1, 1, 1, NC), lambda g, b: (g, b, 0, 0)),
                   pl.BlockSpec((1, 1, N, S), lambda g, b: (g, b, 0, 0))),
        compiler_params=pltpu.CompilerParams(
            dimension_semantics=("parallel", "parallel")),
    )(*inputs)

    out_mean = out_mean.reshape(3, B, NC)
    out = out_mean[0] + out_mean[1] + out_mean[2]          # (B, NC)
    unsup_concept_attn = attn[0]                           # (B, N, n_unsup)
    concept_attn = attn[1].mean(axis=1)                    # (B, n_concepts)
    spatial_concept_attn = attn[2]                         # (B, N, n_spatial)
    return out, unsup_concept_attn, concept_attn, spatial_concept_attn


# ------------------------------ parameter init ------------------------------
def _xavier(key, shape):
    fan_in, fan_out = shape[-2], shape[-1]
    lim = (6.0 / (fan_in + fan_out)) ** 0.5
    return jax.random.uniform(key, shape, jnp.float32, -lim, lim)


def init_qsa_params(key, D):
    """ConceptQuerySlotAttention params, packed for the kernel."""
    ks = jax.random.split(key, 7)
    wk = _xavier(ks[0], (D, D))
    wv = _xavier(ks[1], (D, D))
    wq = _xavier(ks[2], (D, D)) * (float(D) ** -0.5)        # qk scale folded in
    wih = [_xavier(k, (D, D)) for k in jax.random.split(ks[3], 3)]   # [r, z, n]
    whh = [_xavier(k, (D, D)) for k in jax.random.split(ks[4], 3)]
    zero = jnp.zeros((D, D), jnp.float32)
    # Merged GRU weight: rows [input | hidden], columns [r | z | n_in | n_hid].
    gru_w = jnp.concatenate([
        jnp.concatenate([wih[0], wih[1], wih[2], zero], axis=1),
        jnp.concatenate([whh[0], whh[1], zero, whh[2]], axis=1),
    ], axis=0)                                               # (2D, 4D)
    # bias layout [b_ir+b_hr | b_iz+b_hz | b_in | b_hn]; zero-init here.
    gru_b = jnp.zeros((1, 4 * D), jnp.float32)
    return {
        "ln_in_g": jnp.ones((1, D), jnp.float32),
        "ln_in_b": jnp.zeros((1, D), jnp.float32),
        "wkv": jnp.concatenate([wk, wv], axis=1),            # (D, 2D)
        "wq": wq,
        "ln_slots_g": jnp.ones((1, D), jnp.float32),
        "ln_slots_b": jnp.zeros((1, D), jnp.float32),
        "gru_w": gru_w,
        "gru_b": gru_b,
        "ln_mlp_g": jnp.ones((1, D), jnp.float32),
        "ln_mlp_b": jnp.zeros((1, D), jnp.float32),
        "mlp_w1": _xavier(ks[5], (D, D)),
        "mlp_b1": jnp.zeros((1, D), jnp.float32),
        "mlp_w2": _xavier(ks[6], (D, D)),
        "mlp_b2": jnp.zeros((1, D), jnp.float32),
    }


def init_xattn_params(key, D, H, n_out):
    """CrossAttention params, pre-split per head, scale + v->proj folds applied."""
    ks = jax.random.split(key, 3)
    # TODO(synk): scale = dim**-0.5 reproduced verbatim from the reference;
    # switch to (D//H)**-0.5 here if the upstream CrossAttention uses head_dim.
    wq = _xavier(ks[0], (D, D)) * (float(D) ** -0.5)
    wkv = _xavier(ks[1], (D, 2 * D))
    wk, wv = wkv[:, :D], wkv[:, D:]
    proj_w = _xavier(ks[2], (D, n_out))
    proj_b = jnp.zeros((1, n_out), jnp.float32)
    Dh = D // H
    wq_h = jnp.stack([wq[:, h * Dh:(h + 1) * Dh] for h in range(H)], axis=0)   # (H,D,Dh)
    wk_h = jnp.stack([wk[:, h * Dh:(h + 1) * Dh] for h in range(H)], axis=0)   # (H,D,Dh)
    # Exact fold: per-token logits = sum_h a_h @ (y @ wv_h) @ proj_w_rows_h + b.
    wvp_h = jnp.stack([wv[:, h * Dh:(h + 1) * Dh] @ proj_w[h * Dh:(h + 1) * Dh, :]
                       for h in range(H)], axis=0)                              # (H,D,NC)
    return {"wq_h": wq_h, "wk_h": wk_h, "wvp_h": wvp_h, "proj_b": proj_b}


def init_model_params(key, D=EMBED_DIM):
    assert N_UNSUP == N_CONCEPTS == N_SPATIAL, "branch batching assumes equal slot counts"
    ks = jax.random.split(key, 8)

    # Per-branch slot-attention params, stacked along a leading branch axis
    # (0 = unsup, 1 = concept, 2 = spatial).
    sa_branches = [init_qsa_params(ks[i], D) for i in range(3)]
    sa = jax.tree_util.tree_map(lambda *a: jnp.stack(a, axis=0), *sa_branches)

    # NOTE: the reference forward routes BOTH the unsup and the concept branch
    # through `concept_tranformer` — reproduced verbatim (branch 0 and 1 share
    # the concept cross-attention weights); the unused unsup_concept_tranformer
    # parameters are therefore not allocated.
    concept_ct = init_xattn_params(ks[3], D, NUM_HEADS, NUM_CLASSES)
    spatial_ct = init_xattn_params(ks[4], D, NUM_HEADS, NUM_CLASSES)
    ct = jax.tree_util.tree_map(lambda *a: jnp.stack(a, axis=0),
                                concept_ct, concept_ct, spatial_ct)

    slots_init = jnp.stack([_xavier(ks[5], (N_UNSUP, D)),
                            _xavier(ks[6], (N_CONCEPTS, D)),
                            _xavier(ks[7], (N_SPATIAL, D))], axis=0)

    # slot_pos: branch 0 = unsup pos, 1 = concept pos (zero-init trainable, as
    # in the reference); branch 2 is frozen zero because the reference forward
    # never adds spatial_concept_slot_pos.
    slot_pos = jnp.zeros((3, N_UNSUP, D), jnp.float32)

    return {"sa": sa, "ct": ct, "slots_init": slots_init, "slot_pos": slot_pos}


# ---------------------------------- main ------------------------------------
if __name__ == "__main__":
    root = jax.random.PRNGKey(0)
    k_params, k_x, k_fwd = jax.random.split(root, 3)

    B, N, D = 2, 16, EMBED_DIM          # batch, tokens (4x4 Swin patches), embedding
    x = jax.random.normal(k_x, (B, N, D), jnp.float32)
    params = init_model_params(k_params, D)

    fwd = jax.jit(functools.partial(ctc_swin_qsa_forward, sigma=0.0))
    out, unsup_attn, concept_attn, spatial_attn = fwd(params, x, k_fwd)

    jax.block_until_ready((out, unsup_attn, concept_attn, spatial_attn))
    assert out.shape == (B, NUM_CLASSES)
    assert unsup_attn.shape == (B, N, N_UNSUP)
    assert concept_attn.shape == (B, N_CONCEPTS)
    assert spatial_attn.shape == (B, N, N_SPATIAL)
    print("KERNEL_OK")
</pallas_src>

<mosaic_0001>
module attributes {stable_mosaic.version = 11 : i64} {
  func.func @_ctc_kernel(%arg0: i32, %arg1: i32, %arg2: memref<1x16x32xf32, #tpu.memory_space<vmem>>, %arg3: memref<1x1x8x32xf32, #tpu.memory_space<vmem>>, %arg4: memref<1x1x32xf32, #tpu.memory_space<vmem>>, %arg5: memref<1x1x32xf32, #tpu.memory_space<vmem>>, %arg6: memref<1x32x64xf32, #tpu.memory_space<vmem>>, %arg7: memref<1x32x32xf32, #tpu.memory_space<vmem>>, %arg8: memref<1x1x32xf32, #tpu.memory_space<vmem>>, %arg9: memref<1x1x32xf32, #tpu.memory_space<vmem>>, %arg10: memref<1x64x128xf32, #tpu.memory_space<vmem>>, %arg11: memref<1x1x128xf32, #tpu.memory_space<vmem>>, %arg12: memref<1x1x32xf32, #tpu.memory_space<vmem>>, %arg13: memref<1x1x32xf32, #tpu.memory_space<vmem>>, %arg14: memref<1x32x32xf32, #tpu.memory_space<vmem>>, %arg15: memref<1x1x32xf32, #tpu.memory_space<vmem>>, %arg16: memref<1x32x32xf32, #tpu.memory_space<vmem>>, %arg17: memref<1x1x32xf32, #tpu.memory_space<vmem>>, %arg18: memref<1x8x32xf32, #tpu.memory_space<vmem>>, %arg19: memref<1x2x32x16xf32, #tpu.memory_space<vmem>>, %arg20: memref<1x2x32x16xf32, #tpu.memory_space<vmem>>, %arg21: memref<1x2x32x10xf32, #tpu.memory_space<vmem>>, %arg22: memref<1x1x10xf32, #tpu.memory_space<vmem>>, %arg23: memref<1x1x1x10xf32, #tpu.memory_space<vmem>>, %arg24: memref<1x1x16x8xf32, #tpu.memory_space<vmem>>) attributes {dimension_semantics = [#tpu.dimension_semantics<parallel>, #tpu.dimension_semantics<parallel>], iteration_bounds = array<i64: 3, 2>, scalar_prefetch = 0 : i64, scratch_operands = 0 : i64, tpu.core_type = #tpu.core_type<tc>, window_params = [{transform_indices = @transform_0, window_bounds = array<i64: 1, 16, 32>}, {transform_indices = @transform_1, window_bounds = array<i64: 1, 1, 8, 32>}, {transform_indices = @transform_2, window_bounds = array<i64: 1, 1, 32>}, {transform_indices = @transform_3, window_bounds = array<i64: 1, 1, 32>}, {transform_indices = @transform_4, window_bounds = array<i64: 1, 32, 64>}, {transform_indices = @transform_5, window_bounds = array<i64: 1, 32, 32>}, {transform_indices = @transform_6, window_bounds = array<i64: 1, 1, 32>}, {transform_indices = @transform_7, window_bounds = array<i64: 1, 1, 32>}, {transform_indices = @transform_8, window_bounds = array<i64: 1, 64, 128>}, {transform_indices = @transform_9, window_bounds = array<i64: 1, 1, 128>}, {transform_indices = @transform_10, window_bounds = array<i64: 1, 1, 32>}, {transform_indices = @transform_11, window_bounds = array<i64: 1, 1, 32>}, {transform_indices = @transform_12, window_bounds = array<i64: 1, 32, 32>}, {transform_indices = @transform_13, window_bounds = array<i64: 1, 1, 32>}, {transform_indices = @transform_14, window_bounds = array<i64: 1, 32, 32>}, {transform_indices = @transform_15, window_bounds = array<i64: 1, 1, 32>}, {transform_indices = @transform_16, window_bounds = array<i64: 1, 8, 32>}, {transform_indices = @transform_17, window_bounds = array<i64: 1, 2, 32, 16>}, {transform_indices = @transform_18, window_bounds = array<i64: 1, 2, 32, 16>}, {transform_indices = @transform_19, window_bounds = array<i64: 1, 2, 32, 10>}, {transform_indices = @transform_20, window_bounds = array<i64: 1, 1, 10>}, {transform_indices = @transform_21, window_bounds = array<i64: 1, 1, 1, 10>}, {transform_indices = @transform_22, window_bounds = array<i64: 1, 1, 16, 8>}]} {
    %c0 = arith.constant 0 : index
    %c0_0 = arith.constant 0 : index
    %c0_1 = arith.constant 0 : index
    %0 = vector.load %arg2[%c0, %c0_0, %c0_1] : memref<1x16x32xf32, #tpu.memory_space<vmem>>, vector<1x16x32xf32>
    %1 = vector.shape_cast %0 : vector<1x16x32xf32> to vector<16x32xf32>
    %c0_2 = arith.constant 0 : index
    %c0_3 = arith.constant 0 : index
    %c0_4 = arith.constant 0 : index
    %2 = vector.load %arg4[%c0_2, %c0_3, %c0_4] : memref<1x1x32xf32, #tpu.memory_space<vmem>>, vector<1x1x32xf32>
    %3 = vector.shape_cast %2 : vector<1x1x32xf32> to vector<1x32xf32>
    %c0_5 = arith.constant 0 : index
    %c0_6 = arith.constant 0 : index
    %c0_7 = arith.constant 0 : index
    %4 = vector.load %arg5[%c0_5, %c0_6, %c0_7] : memref<1x1x32xf32, #tpu.memory_space<vmem>>, vector<1x1x32xf32>
    %5 = vector.shape_cast %4 : vector<1x1x32xf32> to vector<1x32xf32>
    %cst = arith.constant dense<0.000000e+00> : vector<16xf32>
    %6 = vector.multi_reduction <add>, %1, %cst [1] : vector<16x32xf32> to vector<16xf32>
    %7 = vector.shape_cast %6 : vector<16xf32> to vector<16x1xf32>
    %cst_8 = arith.constant 3.200000e+01 : f32
    %8 = vector.broadcast %cst_8 : f32 to vector<16x1xf32>
    %9 = arith.divf %7, %8 : vector<16x1xf32>
    %10 = vector.broadcast %9 : vector<16x1xf32> to vector<16x32xf32>
    %11 = arith.subf %1, %10 : vector<16x32xf32>
    %12 = arith.mulf %11, %11 : vector<16x32xf32>
    %cst_9 = arith.constant dense<0.000000e+00> : vector<16xf32>
    %13 = vector.multi_reduction <add>, %12, %cst_9 [1] : vector<16x32xf32> to vector<16xf32>
    %14 = vector.shape_cast %13 : vector<16xf32> to vector<16x1xf32>
    %cst_10 = arith.constant 3.200000e+01 : f32
    %15 = vector.broadcast %cst_10 : f32 to vector<16x1xf32>
    %16 = arith.divf %14, %15 : vector<16x1xf32>
    %17 = vector.broadcast %9 : vector<16x1xf32> to vector<16x32xf32>
    %18 = arith.subf %1, %17 : vector<16x32xf32>
    %cst_11 = arith.constant 9.99999974E-6 : f32
    %19 = vector.broadcast %cst_11 : f32 to vector<16x1xf32>
    %20 = arith.addf %16, %19 : vector<16x1xf32>
    %21 = math.rsqrt %20 : vector<16x1xf32>
    %22 = vector.broadcast %21 : vector<16x1xf32> to vector<16x32xf32>
    %23 = arith.mulf %18, %22 : vector<16x32xf32>
    %24 = vector.broadcast %3 : vector<1x32xf32> to vector<16x32xf32>
    %25 = arith.mulf %23, %24 : vector<16x32xf32>
    %26 = vector.broadcast %5 : vector<1x32xf32> to vector<16x32xf32>
    %27 = arith.addf %25, %26 : vector<16x32xf32>
    %c0_12 = arith.constant 0 : index
    %c0_13 = arith.constant 0 : index
    %c0_14 = arith.constant 0 : index
    %28 = vector.load %arg6[%c0_12, %c0_13, %c0_14] : memref<1x32x64xf32, #tpu.memory_space<vmem>>, vector<1x32x64xf32>
    %29 = vector.shape_cast %28 : vector<1x32x64xf32> to vector<32x64xf32>
    %cst_15 = arith.constant dense<0.000000e+00> : vector<16x64xf32>
    %30 = tpu.matmul %27, %29, %cst_15 {dimension_numbers = #tpu.dot_dimension_numbers<[1], [0], [0], [1], [0, 0, 1, 1], [], []>} : vector<16x32xf32>, vector<32x64xf32>, vector<16x64xf32> -> vector<16x64xf32>
    %31 = vector.extract_strided_slice %30 {offsets = [0, 0], sizes = [16, 32], strides = [1, 1]} : vector<16x64xf32> to vector<16x32xf32>
    %32 = vector.extract_strided_slice %30 {offsets = [0, 32], sizes = [16, 32], strides = [1, 1]} : vector<16x64xf32> to vector<16x32xf32>
    %c0_16 = arith.constant 0 : index
    %c0_17 = arith.constant 0 : index
    %c0_18 = arith.constant 0 : index
    %c0_19 = arith.constant 0 : index
    %33 = vector.load %arg3[%c0_16, %c0_17, %c0_18, %c0_19] : memref<1x1x8x32xf32, #tpu.memory_space<vmem>>, vector<1x1x8x32xf32>
    %34 = vector.shape_cast %33 : vector<1x1x8x32xf32> to vector<8x32xf32>
    %c0_20 = arith.constant 0 : index
    %c0_21 = arith.constant 0 : index
    %c0_22 = arith.constant 0 : index
    %35 = vector.load %arg8[%c0_20, %c0_21, %c0_22] : memref<1x1x32xf32, #tpu.memory_space<vmem>>, vector<1x1x32xf32>
    %36 = vector.shape_cast %35 : vector<1x1x32xf32> to vector<1x32xf32>
    %c0_23 = arith.constant 0 : index
    %c0_24 = arith.constant 0 : index
    %c0_25 = arith.constant 0 : index
    %37 = vector.load %arg9[%c0_23, %c0_24, %c0_25] : memref<1x1x32xf32, #tpu.memory_space<vmem>>, vector<1x1x32xf32>
    %38 = vector.shape_cast %37 : vector<1x1x32xf32> to vector<1x32xf32>
    %cst_26 = arith.constant dense<0.000000e+00> : vector<8xf32>
    %39 = vector.multi_reduction <add>, %34, %cst_26 [1] : vector<8x32xf32> to vector<8xf32>
    %40 = vector.shape_cast %39 : vector<8xf32> to vector<8x1xf32>
    %cst_27 = arith.constant 3.200000e+01 : f32
    %41 = vector.broadcast %cst_27 : f32 to vector<8x1xf32>
    %42 = arith.divf %40, %41 : vector<8x1xf32>
    %43 = vector.broadcast %42 : vector<8x1xf32> to vector<8x32xf32>
    %44 = arith.subf %34, %43 : vector<8x32xf32>
    %45 = arith.mulf %44, %44 : vector<8x32xf32>
    %cst_28 = arith.constant dense<0.000000e+00> : vector<8xf32>
    %46 = vector.multi_reduction <add>, %45, %cst_28 [1] : vector<8x32xf32> to vector<8xf32>
    %47 = vector.shape_cast %46 : vector<8xf32> to vector<8x1xf32>
    %cst_29 = arith.constant 3.200000e+01 : f32
    %48 = vector.broadcast %cst_29 : f32 to vector<8x1xf32>
    %49 = arith.divf %47, %48 : vector<8x1xf32>
    %50 = vector.broadcast %42 : vector<8x1xf32> to vector<8x32xf32>
    %51 = arith.subf %34, %50 : vector<8x32xf32>
    %cst_30 = arith.constant 9.99999974E-6 : f32
    %52 = vector.broadcast %cst_30 : f32 to vector<8x1xf32>
    %53 = arith.addf %49, %52 : vector<8x1xf32>
    %54 = math.rsqrt %53 : vector<8x1xf32>
    %55 = vector.broadcast %54 : vector<8x1xf32> to vector<8x32xf32>
    %56 = arith.mulf %51, %55 : vector<8x32xf32>
    %57 = vector.broadcast %36 : vector<1x32xf32> to vector<8x32xf32>
    %58 = arith.mulf %56, %57 : vector<8x32xf32>
    %59 = vector.broadcast %38 : vector<1x32xf32> to vector<8x32xf32>
    %60 = arith.addf %58, %59 : vector<8x32xf32>
    %c0_31 = arith.constant 0 : index
    %c0_32 = arith.constant 0 : index
    %c0_33 = arith.constant 0 : index
    %61 = vector.load %arg7[%c0_31, %c0_32, %c0_33] : memref<1x32x32xf32, #tpu.memory_space<vmem>>, vector<1x32x32xf32>
    %62 = vector.shape_cast %61 : vector<1x32x32xf32> to vector<32x32xf32>
    %cst_34 = arith.constant dense<0.000000e+00> : vector<8x32xf32>
    %63 = tpu.matmul %60, %62, %cst_34 {dimension_numbers = #tpu.dot_dimension_numbers<[1], [0], [0], [1], [0, 0, 1, 1], [], []>} : vector<8x32xf32>, vector<32x32xf32>, vector<8x32xf32> -> vector<8x32xf32>
    %cst_35 = arith.constant dense<0.000000e+00> : vector<8x16xf32>
    %64 = tpu.matmul %63, %31, %cst_35 {dimension_numbers = #tpu.dot_dimension_numbers<[1], [1], [0], [0], [0, 0, 1, 0], [], []>} : vector<8x32xf32>, vector<16x32xf32>, vector<8x16xf32> -> vector<8x16xf32>
    %cst_36 = arith.constant dense<0xFF800000> : vector<16xf32>
    %65 = vector.multi_reduction <maximumf>, %64, %cst_36 [0] : vector<8x16xf32> to vector<16xf32>
    %66 = vector.shape_cast %65 : vector<16xf32> to vector<1x16xf32>
    %67 = vector.broadcast %66 : vector<1x16xf32> to vector<8x16xf32>
    %68 = arith.subf %64, %67 : vector<8x16xf32>
    %69 = math.exp %68 : vector<8x16xf32>
    %cst_37 = arith.constant dense<0.000000e+00> : vector<16xf32>
    %70 = vector.multi_reduction <add>, %69, %cst_37 [0] : vector<8x16xf32> to vector<16xf32>
    %71 = vector.shape_cast %70 : vector<16xf32> to vector<1x16xf32>
    %72 = vector.broadcast %71 : vector<1x16xf32> to vector<8x16xf32>
    %73 = arith.divf %69, %72 : vector<8x16xf32>
    %cst_38 = arith.constant 9.99999993E-9 : f32
    %74 = vector.broadcast %cst_38 : f32 to vector<8x16xf32>
    %75 = arith.addf %73, %74 : vector<8x16xf32>
    %cst_39 = arith.constant dense<0.000000e+00> : vector<8xf32>
    %76 = vector.multi_reduction <add>, %75, %cst_39 [1] : vector<8x16xf32> to vector<8xf32>
    %77 = vector.shape_cast %76 : vector<8xf32> to vector<8x1xf32>
    %78 = vector.broadcast %77 : vector<8x1xf32> to vector<8x16xf32>
    %79 = arith.divf %75, %78 : vector<8x16xf32>
    %cst_40 = arith.constant dense<0.000000e+00> : vector<8x32xf32>
    %80 = tpu.matmul %79, %32, %cst_40 {dimension_numbers = #tpu.dot_dimension_numbers<[1], [0], [0], [1], [0, 0, 1, 1], [], []>} : vector<8x16xf32>, vector<16x32xf32>, vector<8x32xf32> -> vector<8x32xf32>
    %81 = tpu.concatenate %80, %34 in 1 : vector<8x32xf32>, vector<8x32xf32> -> vector<8x64xf32>
    %c0_41 = arith.constant 0 : index
    %c0_42 = arith.constant 0 : index
    %c0_43 = arith.constant 0 : index
    %82 = vector.load %arg10[%c0_41, %c0_42, %c0_43] : memref<1x64x128xf32, #tpu.memory_space<vmem>>, vector<1x64x128xf32>
    %83 = vector.shape_cast %82 : vector<1x64x128xf32> to vector<64x128xf32>
    %cst_44 = arith.constant dense<0.000000e+00> : vector<8x128xf32>
    %84 = tpu.matmul %81, %83, %cst_44 {dimension_numbers = #tpu.dot_dimension_numbers<[1], [0], [0], [1], [0, 0, 1, 1], [], []>} : vector<8x64xf32>, vector<64x128xf32>, vector<8x128xf32> -> vector<8x128xf32>
    %c0_45 = arith.constant 0 : index
    %c0_46 = arith.constant 0 : index
    %c0_47 = arith.constant 0 : index
    %85 = vector.load %arg11[%c0_45, %c0_46, %c0_47] : memref<1x1x128xf32, #tpu.memory_space<vmem>>, vector<1x1x128xf32>
    %86 = vector.shape_cast %85 : vector<1x1x128xf32> to vector<1x128xf32>
    %87 = vector.broadcast %86 : vector<1x128xf32> to vector<8x128xf32>
    %88 = arith.addf %84, %87 : vector<8x128xf32>
    %89 = vector.extract_strided_slice %88 {offsets = [0, 0], sizes = [8, 32], strides = [1, 1]} : vector<8x128xf32> to vector<8x32xf32>
    %90 = arith.negf %89 : vector<8x32xf32>
    %91 = math.exp %90 : vector<8x32xf32>
    %cst_48 = arith.constant 1.000000e+00 : f32
    %92 = vector.broadcast %cst_48 : f32 to vector<8x32xf32>
    %93 = arith.addf %92, %91 : vector<8x32xf32>
    %94 = arith.divf %92, %93 : vector<8x32xf32>
    %95 = vector.extract_strided_slice %88 {offsets = [0, 32], sizes = [8, 32], strides = [1, 1]} : vector<8x128xf32> to vector<8x32xf32>
    %96 = arith.negf %95 : vector<8x32xf32>
    %97 = math.exp %96 : vector<8x32xf32>
    %cst_49 = arith.constant 1.000000e+00 : f32
    %98 = vector.broadcast %cst_49 : f32 to vector<8x32xf32>
    %99 = arith.addf %98, %97 : vector<8x32xf32>
    %100 = arith.divf %98, %99 : vector<8x32xf32>
    %101 = vector.extract_strided_slice %88 {offsets = [0, 64], sizes = [8, 32], strides = [1, 1]} : vector<8x128xf32> to vector<8x32xf32>
    %102 = vector.extract_strided_slice %88 {offsets = [0, 96], sizes = [8, 32], strides = [1, 1]} : vector<8x128xf32> to vector<8x32xf32>
    %103 = arith.mulf %94, %102 : vector<8x32xf32>
    %104 = arith.addf %101, %103 : vector<8x32xf32>
    %105 = math.tanh %104 : vector<8x32xf32>
    %cst_50 = arith.constant 1.000000e+00 : f32
    %106 = vector.broadcast %cst_50 : f32 to vector<8x32xf32>
    %107 = arith.subf %106, %100 : vector<8x32xf32>
    %108 = arith.mulf %107, %105 : vector<8x32xf32>
    %109 = arith.mulf %100, %34 : vector<8x32xf32>
    %110 = arith.addf %108, %109 : vector<8x32xf32>
    %c0_51 = arith.constant 0 : index
    %c0_52 = arith.constant 0 : index
    %c0_53 = arith.constant 0 : index
    %111 = vector.load %arg12[%c0_51, %c0_52, %c0_53] : memref<1x1x32xf32, #tpu.memory_space<vmem>>, vector<1x1x32xf32>
    %112 = vector.shape_cast %111 : vector<1x1x32xf32> to vector<1x32xf32>
    %c0_54 = arith.constant 0 : index
    %c0_55 = arith.constant 0 : index
    %c0_56 = arith.constant 0 : index
    %113 = vector.load %arg13[%c0_54, %c0_55, %c0_56] : memref<1x1x32xf32, #tpu.memory_space<vmem>>, vector<1x1x32xf32>
    %114 = vector.shape_cast %113 : vector<1x1x32xf32> to vector<1x32xf32>
    %cst_57 = arith.constant dense<0.000000e+00> : vector<8xf32>
    %115 = vector.multi_reduction <add>, %110, %cst_57 [1] : vector<8x32xf32> to vector<8xf32>
    %116 = vector.shape_cast %115 : vector<8xf32> to vector<8x1xf32>
    %cst_58 = arith.constant 3.200000e+01 : f32
    %117 = vector.broadcast %cst_58 : f32 to vector<8x1xf32>
    %118 = arith.divf %116, %117 : vector<8x1xf32>
    %119 = vector.broadcast %118 : vector<8x1xf32> to vector<8x32xf32>
    %120 = arith.subf %110, %119 : vector<8x32xf32>
    %121 = arith.mulf %120, %120 : vector<8x32xf32>
    %cst_59 = arith.constant dense<0.000000e+00> : vector<8xf32>
    %122 = vector.multi_reduction <add>, %121, %cst_59 [1] : vector<8x32xf32> to vector<8xf32>
    %123 = vector.shape_cast %122 : vector<8xf32> to vector<8x1xf32>
    %cst_60 = arith.constant 3.200000e+01 : f32
    %124 = vector.broadcast %cst_60 : f32 to vector<8x1xf32>
    %125 = arith.divf %123, %124 : vector<8x1xf32>
    %126 = vector.broadcast %118 : vector<8x1xf32> to vector<8x32xf32>
    %127 = arith.subf %110, %126 : vector<8x32xf32>
    %cst_61 = arith.constant 9.99999974E-6 : f32
    %128 = vector.broadcast %cst_61 : f32 to vector<8x1xf32>
    %129 = arith.addf %125, %128 : vector<8x1xf32>
    %130 = math.rsqrt %129 : vector<8x1xf32>
    %131 = vector.broadcast %130 : vector<8x1xf32> to vector<8x32xf32>
    %132 = arith.mulf %127, %131 : vector<8x32xf32>
    %133 = vector.broadcast %112 : vector<1x32xf32> to vector<8x32xf32>
    %134 = arith.mulf %132, %133 : vector<8x32xf32>
    %135 = vector.broadcast %114 : vector<1x32xf32> to vector<8x32xf32>
    %136 = arith.addf %134, %135 : vector<8x32xf32>
    %c0_62 = arith.constant 0 : index
    %c0_63 = arith.constant 0 : index
    %c0_64 = arith.constant 0 : index
    %137 = vector.load %arg14[%c0_62, %c0_63, %c0_64] : memref<1x32x32xf32, #tpu.memory_space<vmem>>, vector<1x32x32xf32>
    %138 = vector.shape_cast %137 : vector<1x32x32xf32> to vector<32x32xf32>
    %cst_65 = arith.constant dense<0.000000e+00> : vector<8x32xf32>
    %139 = tpu.matmul %136, %138, %cst_65 {dimension_numbers = #tpu.dot_dimension_numbers<[1], [0], [0], [1], [0, 0, 1, 1], [], []>} : vector<8x32xf32>, vector<32x32xf32>, vector<8x32xf32> -> vector<8x32xf32>
    %c0_66 = arith.constant 0 : index
    %c0_67 = arith.constant 0 : index
    %c0_68 = arith.constant 0 : index
    %140 = vector.load %arg15[%c0_66, %c0_67, %c0_68] : memref<1x1x32xf32, #tpu.memory_space<vmem>>, vector<1x1x32xf32>
    %141 = vector.shape_cast %140 : vector<1x1x32xf32> to vector<1x32xf32>
    %142 = vector.broadcast %141 : vector<1x32xf32> to vector<8x32xf32>
    %143 = arith.addf %139, %142 : vector<8x32xf32>
    %cst_69 = arith.constant 0.000000e+00 : f32
    %144 = vector.broadcast %cst_69 : f32 to vector<8x32xf32>
    %145 = arith.maximumf %143, %144 : vector<8x32xf32>
    %c0_70 = arith.constant 0 : index
    %c0_71 = arith.constant 0 : index
    %c0_72 = arith.constant 0 : index
    %146 = vector.load %arg16[%c0_70, %c0_71, %c0_72] : memref<1x32x32xf32, #tpu.memory_space<vmem>>, vector<1x32x32xf32>
    %147 = vector.shape_cast %146 : vector<1x32x32xf32> to vector<32x32xf32>
    %cst_73 = arith.constant dense<0.000000e+00> : vector<8x32xf32>
    %148 = tpu.matmul %145, %147, %cst_73 {dimension_numbers = #tpu.dot_dimension_numbers<[1], [0], [0], [1], [0, 0, 1, 1], [], []>} : vector<8x32xf32>, vector<32x32xf32>, vector<8x32xf32> -> vector<8x32xf32>
    %149 = arith.addf %110, %148 : vector<8x32xf32>
    %c0_74 = arith.constant 0 : index
    %c0_75 = arith.constant 0 : index
    %c0_76 = arith.constant 0 : index
    %150 = vector.load %arg17[%c0_74, %c0_75, %c0_76] : memref<1x1x32xf32, #tpu.memory_space<vmem>>, vector<1x1x32xf32>
    %151 = vector.shape_cast %150 : vector<1x1x32xf32> to vector<1x32xf32>
    %152 = vector.broadcast %151 : vector<1x32xf32> to vector<8x32xf32>
    %153 = arith.addf %149, %152 : vector<8x32xf32>
    %c0_77 = arith.constant 0 : index
    %c0_78 = arith.constant 0 : index
    %c0_79 = arith.constant 0 : index
    %154 = vector.load %arg18[%c0_77, %c0_78, %c0_79] : memref<1x8x32xf32, #tpu.memory_space<vmem>>, vector<1x8x32xf32>
    %155 = vector.shape_cast %154 : vector<1x8x32xf32> to vector<8x32xf32>
    %156 = arith.addf %153, %155 : vector<8x32xf32>
    %cst_80 = arith.constant 0.000000e+00 : f32
    %157 = vector.broadcast %cst_80 : f32 to vector<16x8xf32>
    %cst_81 = arith.constant 0.000000e+00 : f32
    %158 = vector.broadcast %cst_81 : f32 to vector<1x10xf32>
    %c0_82 = arith.constant 0 : index
    %c0_83 = arith.constant 0 : index
    %c0_84 = arith.constant 0 : index
    %c0_85 = arith.constant 0 : index
    %159 = vector.load %arg19[%c0_82, %c0_83, %c0_84, %c0_85] : memref<1x2x32x16xf32, #tpu.memory_space<vmem>>, vector<1x1x32x16xf32>
    %160 = vector.shape_cast %159 : vector<1x1x32x16xf32> to vector<32x16xf32>
    %cst_86 = arith.constant dense<0.000000e+00> : vector<16x16xf32>
    %161 = tpu.matmul %1, %160, %cst_86 {dimension_numbers = #tpu.dot_dimension_numbers<[1], [0], [0], [1], [0, 0, 1, 1], [], []>} : vector<16x32xf32>, vector<32x16xf32>, vector<16x16xf32> -> vector<16x16xf32>
    %c0_87 = arith.constant 0 : index
    %c0_88 = arith.constant 0 : index
    %c0_89 = arith.constant 0 : index
    %c0_90 = arith.constant 0 : index
    %162 = vector.load %arg20[%c0_87, %c0_88, %c0_89, %c0_90] : memref<1x2x32x16xf32, #tpu.memory_space<vmem>>, vector<1x1x32x16xf32>
    %163 = vector.shape_cast %162 : vector<1x1x32x16xf32> to vector<32x16xf32>
    %cst_91 = arith.constant dense<0.000000e+00> : vector<8x16xf32>
    %164 = tpu.matmul %156, %163, %cst_91 {dimension_numbers = #tpu.dot_dimension_numbers<[1], [0], [0], [1], [0, 0, 1, 1], [], []>} : vector<8x32xf32>, vector<32x16xf32>, vector<8x16xf32> -> vector<8x16xf32>
    %c0_92 = arith.constant 0 : index
    %c0_93 = arith.constant 0 : index
    %c0_94 = arith.constant 0 : index
    %c0_95 = arith.constant 0 : index
    %165 = vector.load %arg21[%c0_92, %c0_93, %c0_94, %c0_95] : memref<1x2x32x10xf32, #tpu.memory_space<vmem>>, vector<1x1x32x10xf32>
    %166 = vector.shape_cast %165 : vector<1x1x32x10xf32> to vector<32x10xf32>
    %cst_96 = arith.constant dense<0.000000e+00> : vector<8x10xf32>
    %167 = tpu.matmul %156, %166, %cst_96 {dimension_numbers = #tpu.dot_dimension_numbers<[1], [0], [0], [1], [0, 0, 1, 1], [], []>} : vector<8x32xf32>, vector<32x10xf32>, vector<8x10xf32> -> vector<8x10xf32>
    %cst_97 = arith.constant dense<0.000000e+00> : vector<16x8xf32>
    %168 = tpu.matmul %161, %164, %cst_97 {dimension_numbers = #tpu.dot_dimension_numbers<[1], [1], [0], [0], [0, 0, 1, 0], [], []>} : vector<16x16xf32>, vector<8x16xf32>, vector<16x8xf32> -> vector<16x8xf32>
    %cst_98 = arith.constant dense<0xFF800000> : vector<16xf32>
    %169 = vector.multi_reduction <maximumf>, %168, %cst_98 [1] : vector<16x8xf32> to vector<16xf32>
    %170 = vector.shape_cast %169 : vector<16xf32> to vector<16x1xf32>
    %171 = vector.broadcast %170 : vector<16x1xf32> to vector<16x8xf32>
    %172 = arith.subf %168, %171 : vector<16x8xf32>
    %173 = math.exp %172 : vector<16x8xf32>
    %cst_99 = arith.constant dense<0.000000e+00> : vector<16xf32>
    %174 = vector.multi_reduction <add>, %173, %cst_99 [1] : vector<16x8xf32> to vector<16xf32>
    %175 = vector.shape_cast %174 : vector<16xf32> to vector<16x1xf32>
    %176 = vector.broadcast %175 : vector<16x1xf32> to vector<16x8xf32>
    %177 = arith.divf %173, %176 : vector<16x8xf32>
    %178 = arith.addf %157, %177 : vector<16x8xf32>
    %cst_100 = arith.constant dense<0.000000e+00> : vector<8xf32>
    %179 = vector.multi_reduction <add>, %177, %cst_100 [0] : vector<16x8xf32> to vector<8xf32>
    %180 = vector.shape_cast %179 : vector<8xf32> to vector<1x8xf32>
    %cst_101 = arith.constant 1.600000e+01 : f32
    %181 = vector.broadcast %cst_101 : f32 to vector<1x8xf32>
    %182 = arith.divf %180, %181 : vector<1x8xf32>
    %cst_102 = arith.constant dense<0.000000e+00> : vector<1x10xf32>
    %183 = tpu.matmul %182, %167, %cst_102 {dimension_numbers = #tpu.dot_dimension_numbers<[1], [0], [0], [1], [0, 0, 1, 1], [], []>} : vector<1x8xf32>, vector<8x10xf32>, vector<1x10xf32> -> vector<1x10xf32>
    %184 = arith.addf %158, %183 : vector<1x10xf32>
    %c0_103 = arith.constant 0 : index
    %c1 = arith.constant 1 : index
    %c0_104 = arith.constant 0 : index
    %c0_105 = arith.constant 0 : index
    %185 = vector.load %arg19[%c0_103, %c1, %c0_104, %c0_105] : memref<1x2x32x16xf32, #tpu.memory_space<vmem>>, vector<1x1x32x16xf32>
    %186 = vector.shape_cast %185 : vector<1x1x32x16xf32> to vector<32x16xf32>
    %cst_106 = arith.constant dense<0.000000e+00> : vector<16x16xf32>
    %187 = tpu.matmul %1, %186, %cst_106 {dimension_numbers = #tpu.dot_dimension_numbers<[1], [0], [0], [1], [0, 0, 1, 1], [], []>} : vector<16x32xf32>, vector<32x16xf32>, vector<16x16xf32> -> vector<16x16xf32>
    %c0_107 = arith.constant 0 : index
    %c1_108 = arith.constant 1 : index
    %c0_109 = arith.constant 0 : index
    %c0_110 = arith.constant 0 : index
    %188 = vector.load %arg20[%c0_107, %c1_108, %c0_109, %c0_110] : memref<1x2x32x16xf32, #tpu.memory_space<vmem>>, vector<1x1x32x16xf32>
    %189 = vector.shape_cast %188 : vector<1x1x32x16xf32> to vector<32x16xf32>
    %cst_111 = arith.constant dense<0.000000e+00> : vector<8x16xf32>
    %190 = tpu.matmul %156, %189, %cst_111 {dimension_numbers = #tpu.dot_dimension_numbers<[1], [0], [0], [1], [0, 0, 1, 1], [], []>} : vector<8x32xf32>, vector<32x16xf32>, vector<8x16xf32> -> vector<8x16xf32>
    %c0_112 = arith.constant 0 : index
    %c1_113 = arith.constant 1 : index
    %c0_114 = arith.constant 0 : index
    %c0_115 = arith.constant 0 : index
    %191 = vector.load %arg21[%c0_112, %c1_113, %c0_114, %c0_115] : memref<1x2x32x10xf32, #tpu.memory_space<vmem>>, vector<1x1x32x10xf32>
    %192 = vector.shape_cast %191 : vector<1x1x32x10xf32> to vector<32x10xf32>
    %cst_116 = arith.constant dense<0.000000e+00> : vector<8x10xf32>
    %193 = tpu.matmul %156, %192, %cst_116 {dimension_numbers = #tpu.dot_dimension_numbers<[1], [0], [0], [1], [0, 0, 1, 1], [], []>} : vector<8x32xf32>, vector<32x10xf32>, vector<8x10xf32> -> vector<8x10xf32>
    %cst_117 = arith.constant dense<0.000000e+00> : vector<16x8xf32>
    %194 = tpu.matmul %187, %190, %cst_117 {dimension_numbers = #tpu.dot_dimension_numbers<[1], [1], [0], [0], [0, 0, 1, 0], [], []>} : vector<16x16xf32>, vector<8x16xf32>, vector<16x8xf32> -> vector<16x8xf32>
    %cst_118 = arith.constant dense<0xFF800000> : vector<16xf32>
    %195 = vector.multi_reduction <maximumf>, %194, %cst_118 [1] : vector<16x8xf32> to vector<16xf32>
    %196 = vector.shape_cast %195 : vector<16xf32> to vector<16x1xf32>
    %197 = vector.broadcast %196 : vector<16x1xf32> to vector<16x8xf32>
    %198 = arith.subf %194, %197 : vector<16x8xf32>
    %199 = math.exp %198 : vector<16x8xf32>
    %cst_119 = arith.constant dense<0.000000e+00> : vector<16xf32>
    %200 = vector.multi_reduction <add>, %199, %cst_119 [1] : vector<16x8xf32> to vector<16xf32>
    %201 = vector.shape_cast %200 : vector<16xf32> to vector<16x1xf32>
    %202 = vector.broadcast %201 : vector<16x1xf32> to vector<16x8xf32>
    %203 = arith.divf %199, %202 : vector<16x8xf32>
    %204 = arith.addf %178, %203 : vector<16x8xf32>
    %cst_120 = arith.constant dense<0.000000e+00> : vector<8xf32>
    %205 = vector.multi_reduction <add>, %203, %cst_120 [0] : vector<16x8xf32> to vector<8xf32>
    %206 = vector.shape_cast %205 : vector<8xf32> to vector<1x8xf32>
    %cst_121 = arith.constant 1.600000e+01 : f32
    %207 = vector.broadcast %cst_121 : f32 to vector<1x8xf32>
    %208 = arith.divf %206, %207 : vector<1x8xf32>
    %cst_122 = arith.constant dense<0.000000e+00> : vector<1x10xf32>
    %209 = tpu.matmul %208, %193, %cst_122 {dimension_numbers = #tpu.dot_dimension_numbers<[1], [0], [0], [1], [0, 0, 1, 1], [], []>} : vector<1x8xf32>, vector<8x10xf32>, vector<1x10xf32> -> vector<1x10xf32>
    %210 = arith.addf %184, %209 : vector<1x10xf32>
    %c0_123 = arith.constant 0 : index
    %c0_124 = arith.constant 0 : index
    %c0_125 = arith.constant 0 : index
    %211 = vector.load %arg22[%c0_123, %c0_124, %c0_125] : memref<1x1x10xf32, #tpu.memory_space<vmem>>, vector<1x1x10xf32>
    %212 = vector.shape_cast %211 : vector<1x1x10xf32> to vector<1x10xf32>
    %213 = arith.addf %210, %212 : vector<1x10xf32>
    %c0_126 = arith.constant 0 : index
    %c0_127 = arith.constant 0 : index
    %c0_128 = arith.constant 0 : index
    %c0_129 = arith.constant 0 : index
    %214 = vector.load %arg23[%c0_126, %c0_127, %c0_128, %c0_129] : memref<1x1x1x10xf32, #tpu.memory_space<vmem>>, vector<1x1x1x10xf32>
    %215 = vector.shape_cast %214 : vector<1x1x1x10xf32> to vector<1x10xf32>
    %216 = vector.shape_cast %213 : vector<1x10xf32> to vector<1x1x1x10xf32>
    tpu.vector_store %arg23[%c0_126, %c0_127, %c0_128, %c0_129], %216 {strides = array<i32>} : memref<1x1x1x10xf32, #tpu.memory_space<vmem>>, vector<1x1x1x10xf32>,
    %cst_130 = arith.constant 5.000000e-01 : f32
    %217 = vector.broadcast %cst_130 : f32 to vector<16x8xf32>
    %218 = arith.mulf %204, %217 : vector<16x8xf32>
    %c0_131 = arith.constant 0 : index
    %c0_132 = arith.constant 0 : index
    %c0_133 = arith.constant 0 : index
    %c0_134 = arith.constant 0 : index
    %219 = vector.load %arg24[%c0_131, %c0_132, %c0_133, %c0_134] : memref<1x1x16x8xf32, #tpu.memory_space<vmem>>, vector<1x1x16x8xf32>
    %220 = vector.shape_cast %219 : vector<1x1x16x8xf32> to vector<16x8xf32>
    %221 = vector.shape_cast %218 : vector<16x8xf32> to vector<1x1x16x8xf32>
    tpu.vector_store %arg24[%c0_131, %c0_132, %c0_133, %c0_134], %221 {strides = array<i32>} : memref<1x1x16x8xf32, #tpu.memory_space<vmem>>, vector<1x1x16x8xf32>,
    return
  }
  func.func @transform_0(%arg0: i32, %arg1: i32) -> (i32, i32, i32) {
    %c0_i32 = arith.constant 0 : i32
    %c0_i32_0 = arith.constant 0 : i32
    %c0_i32_1 = arith.constant 0 : i32
    return %arg1, %c0_i32, %c0_i32_0 : i32, i32, i32
  }
  func.func @transform_1(%arg0: i32, %arg1: i32) -> (i32, i32, i32, i32) {
    %c0_i32 = arith.constant 0 : i32
    %c0_i32_0 = arith.constant 0 : i32
    %c0_i32_1 = arith.constant 0 : i32
    return %arg0, %arg1, %c0_i32, %c0_i32_0 : i32, i32, i32, i32
  }
  func.func @transform_2(%arg0: i32, %arg1: i32) -> (i32, i32, i32) {
    %c0_i32 = arith.constant 0 : i32
    %c0_i32_0 = arith.constant 0 : i32
    %c0_i32_1 = arith.constant 0 : i32
    return %arg0, %c0_i32, %c0_i32_0 : i32, i32, i32
  }
  func.func @transform_3(%arg0: i32, %arg1: i32) -> (i32, i32, i32) {
    %c0_i32 = arith.constant 0 : i32
    %c0_i32_0 = arith.constant 0 : i32
    %c0_i32_1 = arith.constant 0 : i32
    return %arg0, %c0_i32, %c0_i32_0 : i32, i32, i32
  }
  func.func @transform_4(%arg0: i32, %arg1: i32) -> (i32, i32, i32) {
    %c0_i32 = arith.constant 0 : i32
    %c0_i32_0 = arith.constant 0 : i32
    %c0_i32_1 = arith.constant 0 : i32
    return %arg0, %c0_i32, %c0_i32_0 : i32, i32, i32
  }
  func.func @transform_5(%arg0: i32, %arg1: i32) -> (i32, i32, i32) {
    %c0_i32 = arith.constant 0 : i32
    %c0_i32_0 = arith.constant 0 : i32
    %c0_i32_1 = arith.constant 0 : i32
    return %arg0, %c0_i32, %c0_i32_0 : i32, i32, i32
  }
  func.func @transform_6(%arg0: i32, %arg1: i32) -> (i32, i32, i32) {
    %c0_i32 = arith.constant 0 : i32
    %c0_i32_0 = arith.constant 0 : i32
    %c0_i32_1 = arith.constant 0 : i32
    return %arg0, %c0_i32, %c0_i32_0 : i32, i32, i32
  }
  func.func @transform_7(%arg0: i32, %arg1: i32) -> (i32, i32, i32) {
    %c0_i32 = arith.constant 0 : i32
    %c0_i32_0 = arith.constant 0 : i32
    %c0_i32_1 = arith.constant 0 : i32
    return %arg0, %c0_i32, %c0_i32_0 : i32, i32, i32
  }
  func.func @transform_8(%arg0: i32, %arg1: i32) -> (i32, i32, i32) {
    %c0_i32 = arith.constant 0 : i32
    %c0_i32_0 = arith.constant 0 : i32
    %c0_i32_1 = arith.constant 0 : i32
    return %arg0, %c0_i32, %c0_i32_0 : i32, i32, i32
  }
  func.func @transform_9(%arg0: i32, %arg1: i32) -> (i32, i32, i32) {
    %c0_i32 = arith.constant 0 : i32
    %c0_i32_0 = arith.constant 0 : i32
    %c0_i32_1 = arith.constant 0 : i32
    return %arg0, %c0_i32, %c0_i32_0 : i32, i32, i32
  }
  func.func @transform_10(%arg0: i32, %arg1: i32) -> (i32, i32, i32) {
    %c0_i32 = arith.constant 0 : i32
    %c0_i32_0 = arith.constant 0 : i32
    %c0_i32_1 = arith.constant 0 : i32
    return %arg0, %c0_i32, %c0_i32_0 : i32, i32, i32
  }
  func.func @transform_11(%arg0: i32, %arg1: i32) -> (i32, i32, i32) {
    %c0_i32 = arith.constant 0 : i32
    %c0_i32_0 = arith.constant 0 : i32
    %c0_i32_1 = arith.constant 0 : i32
    return %arg0, %c0_i32, %c0_i32_0 : i32, i32, i32
  }
  func.func @transform_12(%arg0: i32, %arg1: i32) -> (i32, i32, i32) {
    %c0_i32 = arith.constant 0 : i32
    %c0_i32_0 = arith.constant 0 : i32
    %c0_i32_1 = arith.constant 0 : i32
    return %arg0, %c0_i32, %c0_i32_0 : i32, i32, i32
  }
  func.func @transform_13(%arg0: i32, %arg1: i32) -> (i32, i32, i32) {
    %c0_i32 = arith.constant 0 : i32
    %c0_i32_0 = arith.constant 0 : i32
    %c0_i32_1 = arith.constant 0 : i32
    return %arg0, %c0_i32, %c0_i32_0 : i32, i32, i32
  }
  func.func @transform_14(%arg0: i32, %arg1: i32) -> (i32, i32, i32) {
    %c0_i32 = arith.constant 0 : i32
    %c0_i32_0 = arith.constant 0 : i32
    %c0_i32_1 = arith.constant 0 : i32
    return %arg0, %c0_i32, %c0_i32_0 : i32, i32, i32
  }
  func.func @transform_15(%arg0: i32, %arg1: i32) -> (i32, i32, i32) {
    %c0_i32 = arith.constant 0 : i32
    %c0_i32_0 = arith.constant 0 : i32
    %c0_i32_1 = arith.constant 0 : i32
    return %arg0, %c0_i32, %c0_i32_0 : i32, i32, i32
  }
  func.func @transform_16(%arg0: i32, %arg1: i32) -> (i32, i32, i32) {
    %c0_i32 = arith.constant 0 : i32
    %c0_i32_0 = arith.constant 0 : i32
    %c0_i32_1 = arith.constant 0 : i32
    return %arg0, %c0_i32, %c0_i32_0 : i32, i32, i32
  }
  func.func @transform_17(%arg0: i32, %arg1: i32) -> (i32, i32, i32, i32) {
    %c0_i32 = arith.constant 0 : i32
    %c0_i32_0 = arith.constant 0 : i32
    %c0_i32_1 = arith.constant 0 : i32
    %c0_i32_2 = arith.constant 0 : i32
    return %arg0, %c0_i32, %c0_i32_0, %c0_i32_1 : i32, i32, i32, i32
  }
  func.func @transform_18(%arg0: i32, %arg1: i32) -> (i32, i32, i32, i32) {
    %c0_i32 = arith.constant 0 : i32
    %c0_i32_0 = arith.constant 0 : i32
    %c0_i32_1 = arith.constant 0 : i32
    %c0_i32_2 = arith.constant 0 : i32
    return %arg0, %c0_i32, %c0_i32_0, %c0_i32_1 : i32, i32, i32, i32
  }
  func.func @transform_19(%arg0: i32, %arg1: i32) -> (i32, i32, i32, i32) {
    %c0_i32 = arith.constant 0 : i32
    %c0_i32_0 = arith.constant 0 : i32
    %c0_i32_1 = arith.constant 0 : i32
    %c0_i32_2 = arith.constant 0 : i32
    return %arg0, %c0_i32, %c0_i32_0, %c0_i32_1 : i32, i32, i32, i32
  }
  func.func @transform_20(%arg0: i32, %arg1: i32) -> (i32, i32, i32) {
    %c0_i32 = arith.constant 0 : i32
    %c0_i32_0 = arith.constant 0 : i32
    %c0_i32_1 = arith.constant 0 : i32
    return %arg0, %c0_i32, %c0_i32_0 : i32, i32, i32
  }
  func.func @transform_21(%arg0: i32, %arg1: i32) -> (i32, i32, i32, i32) {
    %c0_i32 = arith.constant 0 : i32
    %c0_i32_0 = arith.constant 0 : i32
    %c0_i32_1 = arith.constant 0 : i32
    return %arg0, %arg1, %c0_i32, %c0_i32_0 : i32, i32, i32, i32
  }
  func.func @transform_22(%arg0: i32, %arg1: i32) -> (i32, i32, i32, i32) {
    %c0_i32 = arith.constant 0 : i32
    %c0_i32_0 = arith.constant 0 : i32
    %c0_i32_1 = arith.constant 0 : i32
    return %arg0, %arg1, %c0_i32, %c0_i32_0 : i32, i32, i32, i32
  }
}

</mosaic_0001>

<bundles_post_ra>
// kernel: ctc_swin_qsa_forward.3
= control target key start
LH: loop header
LB: loop body
LE: loop exit
PB: predicated region body
PF: predicated region fallthrough
CT: control target
= control target key end

     0   :  { %s3710_s28 = smov 0   ;;  %s3712_s29 = smov 0   ;;  %s4034_s0 = inlined_call_operand.vmem [shape: f32[2,16,32], index: 0, kind: input, shape index: {}]   ;;  %s4035_s1 = inlined_call_operand.vmem [shape: f32[3,2,8,32], index: 1, kind: input, shape index: {}]   ;;  %s4036_s2 = inlined_call_operand.vmem [shape: f32[3,1,32], index: 2, kind: input, shape index: {}]   ;;  %s4037_s3 = inlined_call_operand.vmem [shape: f32[3,1,32], index: 3, kind: input, shape index: {}]   ;;  %s4038_s4 = inlined_call_operand.vmem [shape: f32[3,32,64], index: 4, kind: input, shape index: {}]   ;;  %s4039_s5 = inlined_call_operand.vmem [shape: f32[3,32,32], index: 5, kind: input, shape index: {}]   ;;  %s4040_s6 = inlined_call_operand.vmem [shape: f32[3,1,32], index: 6, kind: input, shape index: {}]   ;;  %s4041_s7 = inlined_call_operand.vmem [shape: f32[3,1,32], index: 7, kind: input, shape index: {}]   ;;  %s4042_s8 = inlined_call_operand.vmem [shape: f32[3,64,128], index: 8, kind: input, shape index: {}]   ;;  %s4043_s9 = inlined_call_operand.vmem [shape: f32[3,1,128], index: 9, kind: input, shape index: {}]   ;;  %s4044_s10 = inlined_call_operand.vmem [shape: f32[3,1,32], index: 10, kind: input, shape index: {}]   ;;  %s4045_s11 = inlined_call_operand.vmem [shape: f32[3,1,32], index: 11, kind: input, shape index: {}]   ;;  %s4046_s12 = inlined_call_operand.vmem [shape: f32[3,32,32], index: 12, kind: input, shape index: {}]   ;;  %s4047_s13 = inlined_call_operand.vmem [shape: f32[3,1,32], index: 13, kind: input, shape index: {}]   ;;  %s4048_s14 = inlined_call_operand.vmem [shape: f32[3,32,32], index: 14, kind: input, shape index: {}]   ;;  %s4049_s15 = inlined_call_operand.vmem [shape: f32[3,1,32], index: 15, kind: input, shape index: {}]   ;;  %s4050_s16 = inlined_call_operand.vmem [shape: f32[3,8,32], index: 16, kind: input, shape index: {}]   ;;  %s4051_s17 = inlined_call_operand.vmem [shape: f32[3,2,32,16], index: 17, kind: input, shape index: {}]   ;;  %s4052_s18 = inlined_call_operand.vmem [shape: f32[3,2,32,16], index: 18, kind: input, shape index: {}]   ;;  %s4053_s19 = inlined_call_operand.vmem [shape: f32[3,2,32,10], index: 19, kind: input, shape index: {}]   ;;  %s4054_s20 = inlined_call_operand.vmem [shape: f32[3,1,10], index: 20, kind: input, shape index: {}]   ;;  %s4055_s21 = inlined_call_operand.vmem [shape: f32[3,2,1,10], index: 21, kind: output, shape index: {0}]   ;;  %s4056_s22 = inlined_call_operand.vmem [shape: f32[3,2,16,8], index: 22, kind: output, shape index: {1}]  }
   0x1   :  { %4061 = sst [smem:[#allocation8_spill]] %s4034_s0  ;;  %s3714_s30 = smov 0  }
   0x2   :  { %4062 = sst [smem:[#allocation9_spill]] %s4035_s1 }
   0x3   :  { %4063 = sst [smem:[#allocation10_spill]] %s4036_s2 }
   0x4   :  { %4064 = sst [smem:[#allocation11_spill]] %s4037_s3  ;;  %s3708_s3 = smov 0  }
   0x5   :  { %4065 = sst [smem:[#allocation12_spill]] %s4038_s4  ;;  %s3716_s4 = smov 0  }
   0x6   :  { %4066 = sst [smem:[#allocation13_spill]] %s4039_s5 }
   0x7   :  { %4067 = sst [smem:[#allocation14_spill]] %s4040_s6 }
   0x8   :  { %4068 = sst [smem:[#allocation15_spill]] %s4054_s20 }
   0x9   :  { %4069 = sst [smem:[#allocation16_spill]] %s4055_s21 }
   0xa   :  { %4070 = sst [smem:[#allocation17_spill]] %s4056_s22 }
   0xb LB: > { %4071 = sst [smem:[#allocation2_spill]] %s3577_s29  ;;  %s42_s0 = sadd.s32 1, %s3577_s29  ;;  %s3585_s4 = sphi %s3716_s4, %s33_s4   ;;  %s3581_s30 = sphi %s3714_s30, %s4092_s30   ;;  %s3577_s29 = sphi %s3712_s29, %s4091_s29   ;;  %s3573_s28 = sphi %s3710_s28, %s4090_s28   ;;  %s3569_s3 = sphi %s3708_s3, %s4089_s3  }
   0xc   : > { %4072 = sst [smem:[#allocation3_spill]] %s3581_s30  ;;  %s45_s23 = sadd.s32 1, %s3581_s30 }
   0xd   : > { %4073 = sst [smem:[#allocation4_spill]] %s3585_s4  ;;  %p43_p0 = scmp.ge.s32.totalorder %s42_s0, 2 }
   0xe   : > { %p3049_p1 = scmp.ge.s32.totalorder %s3585_s4, 1  ;;  %p815_p2 = scmp.lt.s32.totalorder %s3585_s4, 7 }
   0xf   : > { %s4094_s0 = smov (%p43_p0, %s42_s0), 0  ;;  %s4096_s23 = smov (!%p43_p0, %s45_s23), %s3581_s30 }
  0x10   : > { %4074 = sst [smem:[#allocation5_spill]] %s4094_s0  ;;  %p816_p3 = pnand %p3049_p1, %p815_p2 }
  0x11   : > { %p47_p4 = scmp.ge.s32.totalorder %s4096_s23, 3 }
  0x12   : > { %819 = sbr.rel (%p816_p3) target bundleno = 4314 (0x10da), region = 104 }
  0x13   : > { %s4098_s23 = smov (%p47_p4, %s4096_s23), 0 }
  0x14   : > { %4075 = sst [smem:[#allocation6_spill]] %s4098_s23 }
  0x19   : > { %p970_p5 = scmp.lt.s32.totalorder %s3569_s3, 1  ;;  %p975_p6 = scmp.lt.s32.totalorder %s3573_s28, 2  ;;  %vm1077_vm0 = vcmask 261120   ;;  %v3587_v21 = vmov 0.0|0.0   ;;  %vm3588_vm1 = vmmov 0   ;;  %v3589_v34 = vmov 0.0  }
  0x1a   : > { %s4076_s6 = sld [smem:[#allocation8_spill]]  ;;  %s4078_s30 = sld [smem:[#allocation9_spill]]  ;;  %3383 = vmatprep.subr.bf16.mxu1 %v3587_v21  ;;  %3231 = vmatprep.mubr.msk.f32.mxu1 %vm3588_vm1, %v3589_v34  ;;  %vm3391_vm2 = vmpackc.low %vm1077_vm0, %vm1077_vm0  ;;  %vm1392_vm3 = vcmask 130048   ;;  %vm1517_vm4 = vcmask 523264   ;;  %vm2164_vm5 = vcmask 64512   ;;  %vm2696_vm6 = vcmask 73728  }
  0x1b   : > { %s4100_s3 = smov (!%p970_p5, %s3569_s3), 1  ;;  %s4102_s28 = smov (!%p975_p6, %s3573_s28), 2 }
  0x1c   : > { %s3125_s1 = sshll.u32 %s4100_s3, 4  ;;  %s3052_s26 = sshll.u32 %s4102_s28, 1 }
  0x1d   : > { %s3754_s2 = sadd.s32 %s3052_s26, %s4100_s3  ;;  %s4079_s23 = sld [smem:[#allocation12_spill]] }
  0x1e   : > { %4077 = sst [smem:[#allocation7_spill]] %s3754_s2  ;;  %s3053_s27 = sshll.u32 %s3754_s2, 3 }
  0x1f   : > { %s4082_s5 = sld [smem:[#allocation11_spill]]  ;;  %s4083_s4 = sld [smem:[#allocation14_spill]] }
  0x20   : > { %s974_s25 = scalar_lea.vmem %s4076_s6, %s3125_s1  ;;  %s982_s29 = scalar_lea.vmem %s4078_s30, %s3053_s27 }
  0x21   : > { %v3746_v0 = vld [vmem:[%s974_s25] sm:$0xff]  ;;  %v3749_v1 = vld [vmem:[%s974_s25 + $0x8] sm:$0xff]  ;;  %s4080_s6 = sld [smem:[#allocation13_spill]]  ;;  %s4081_s30 = sld [smem:[#allocation10_spill]] }
  0x22   : > { %v1078_v2 = vsel %vm1077_vm0, %v3746_v0, 0.0  ;;  %v1081_v3 = vsel %vm1077_vm0, %v3749_v1, 0.0  ;;  %v3762_v4 = vld [vmem:[%s982_s29] sm:$0xff]  ;;  %s3781_s29 = sshll.u32 %s4102_s28, 5  ;;  %s1004_s22 = scalar_lea.vmem %s4041_s7, %s4102_s28 }
  0x23   : > { %1079 = vadd.xlane.f32.xlu0 %v1078_v2  ;;  %v1209_v5 = vsel %vm1077_vm0, %v3762_v4, 0.0  ;;  %s993_s1 = scalar_lea.vmem %s4079_s23, %s3781_s29  ;;  %v3080_v55 = vld [vmem:[%s1004_s22] ss:$0 sm:$0xff]  ;;  %s3590_s20 = smov 96  }
  0x24   : > { %1210 = vadd.xlane.f32.xlu1 %v1209_v5  ;;  %v1121_v22 = vld [vmem:[%s993_s1] sm:$0xff]  ;;  %v1122_v23 = vld [vmem:[%s993_s1 + $0x8] sm:$0xff]  ;;  %v1123_v27 = vld [vmem:[%s993_s1 + $0x10] sm:$0xff]  ;;  %s3836_s22 = sshll.u32 %s4102_s28, 6  ;;  %s3592_s23 = smov 64  }
  0x25   : > { %v3375_v25 = vpack.c.bf16 %v1122_v23, %v1121_v22  ;;  %v1124_v28 = vld [vmem:[%s993_s1 + $0x18] sm:$0xff]  ;;  %s988_s24 = scalar_lea.vmem %s4082_s5, %s4102_s28  ;;  %s1001_s21 = scalar_lea.vmem %s4083_s4, %s4102_s28 }
  0x26   : > { %v3379_v30 = vpack.c.bf16 %v1124_v28, %v1123_v27  ;;  %v3076_v47 = vld [vmem:[%s988_s24] ss:$0 sm:$0xff]  ;;  %s1009_s26 = scalar_lea.vmem %s4042_s8, %s3836_s22  ;;  %s1018_s24 = scalar_lea.vmem %s4045_s11, %s4102_s28 }
  0x27   : > { %1082 = vadd.xlane.f32.xlu0 %v1081_v3  ;;  %s998_s25 = scalar_lea.vmem %s4080_s6, %s3781_s29  ;;  %3376 = vmatprep.subr.bf16.mxu0 %v3375_v25  ;;  %s985_s0 = scalar_lea.vmem %s4081_s30, %s4102_s28  ;;  %v3079_v50 = vld [vmem:[%s1001_s21] ss:$0 sm:$0xff] }
  0x28   : > { %v1236_v24 = vld [vmem:[%s998_s25] sm:$0xff]  ;;  %v1237_v26 = vld [vmem:[%s998_s25 + $0x8] sm:$0xff]  ;;  %3378 = vmatpush3.bf16.msra.mxu0 %v3375_v25  ;;  %v1238_v31 = vld [vmem:[%s998_s25 + $0x10] sm:$0xff]  ;;  %s3591_s21 = smov 32   ;;  %s1015_s4 = scalar_lea.vmem %s4044_s10, %s4102_s28 }
  0x29   : > { %v3384_v29 = vpack.c.bf16 %v1237_v26, %v1236_v24  ;;  %3380 = vmatprep.subr.bf16.mxu0 %v3379_v30  ;;  %v1239_v32 = vld [vmem:[%s998_s25 + $0x18] sm:$0xff]  ;;  %v3075_v45 = vld [vmem:[%s985_s0] ss:$0 sm:$0xff]  ;;  %s1012_s0 = scalar_lea.vmem %s4043_s9, %s4102_s28  ;;  %s1023_s27 = scalar_lea.vmem %s4046_s12, %s3781_s29 }
  0x2a   : > { %v3387_v33 = vpack.c.bf16 %v1239_v32, %v1238_v31  ;;  %s1026_s5 = scalar_lea.vmem %s4047_s13, %s4102_s28  ;;  %s1034_s25 = scalar_lea.vmem %s4049_s15, %s4102_s28 }
  0x2b   : > { %3385 = vmatpush3.bf16.msra.mxu1 %v3384_v29  ;;  %s4087_s6 = sld [smem:[#allocation16_spill]] }
  0x2c   : > { %3386 = vmatprep.subr.bf16.mxu1 %v3587_v21  ;;  %3382 = vmatpush3.bf16.msra.mxu0 %v3379_v30 }
  0x2d   : > { %3389 = vmatprep.subr.bf16.mxu0 %v3587_v21 }
  0x2f   : > { %3388 = vmatpush3.bf16.msra.mxu1 %v3387_v33 }
  0x30   : > { %3393 = vmatprep.subr.bf16.mxu1 %v3587_v21 }
  0xb0   : > { %v1080_v6 = vpop.xlane.xlu0 %1079 }
  0xb1   : > { %v1085_v7 = vmul.f32 0.03125, %v1080_v6  ;;  %v1211_v9 = vpop.xlane.xlu1 %1210 }
  0xb2   : > { %v1212_v11 = vmul.f32 0.03125, %v1211_v9 }
  0xb3   : > { %v1087_v8 = vsub.f32 %v3746_v0, %v1085_v7 }
  0xb4   : > { %v1083_v10 = vpop.xlane.xlu0 %1082  ;;  %v3768_v14 = vsub.f32 %v3762_v4, %v1212_v11 }
  0xb5   : > { %v1086_v12 = vmul.f32 0.03125, %v1083_v10  ;;  %v1089_v13 = vmul.f32 %v1087_v8, %v1087_v8 }
  0xb6   : > { %v1214_v17 = vmul.f32 %v3768_v14, %v3768_v14 }
  0xb7   : > { %v3771_v15 = vsub.f32 %v3749_v1, %v1086_v12  ;;  %v1091_v16 = vsel %vm1077_vm0, %v1089_v13, 0.0 }
  0xb8   : > { %1092 = vadd.xlane.f32.xlu1 %v1091_v16  ;;  %v1215_v19 = vsel %vm1077_vm0, %v1214_v17, 0.0 }
  0xb9   : > { %v1090_v18 = vmul.f32 %v3771_v15, %v3771_v15 }
  0xbb   : > { %v1094_v20 = vsel %vm1077_vm0, %v1090_v18, 0.0 }
  0xbc   : > { %1216 = vadd.xlane.f32.xlu1 %v1215_v19  ;;  %1095 = vadd.xlane.f32.xlu0 %v1094_v20 }
 0x145   : > { %v1093_v35 = vpop.xlane.xlu1 %1092 }
 0x146   : > { %v1097_v36 = vmul.f32 0.03125, %v1093_v35  ;;  %v1502_v35 = vld [vmem:[%s1009_s26] sm:$0xff] }
 0x148   : > { %v1099_v37 = vadd.f32 1e-05, %v1097_v36  ;;  %v1503_v36 = vld [vmem:[%s1009_s26 + $0x8] sm:$0xff] }
 0x149   : > { %v1217_v38 = vpop.xlane.xlu1 %1216  ;;  %v1096_v39 = vpop.xlane.xlu0 %1095 }
 0x14a   : > { %3511 = vrsqrt.f32 %v1099_v37  ;;  %v1218_v40 = vmul.f32 0.03125, %v1217_v38  ;;  %v1098_v41 = vmul.f32 0.03125, %v1096_v39  ;;  %v3397_v38 = vpack.c.bf16 %v1503_v36, %v1502_v35 }
 0x14c   : > { %v1219_v42 = vadd.f32 1e-05, %v1218_v40  ;;  %v1100_v43 = vadd.f32 1e-05, %v1098_v41  ;;  %v1504_v40 = vld [vmem:[%s1009_s26 + $0x10] sm:$0xff]  ;;  %v1505_v41 = vld [vmem:[%s1009_s26 + $0x18] sm:$0xff] }
 0x14e   : > { %3513 = vrsqrt.f32 %v1219_v42  ;;  %v1506_v42 = vld [vmem:[%s1009_s26 + $0x20] sm:$0xff] }
 0x14f   : > { %3515 = vrsqrt.f32 %v1100_v43  ;;  %v1507_v43 = vld [vmem:[%s1009_s26 + $0x28] sm:$0xff] }
 0x154   : > { %v3512_v44 = vpop.eup %3511 }
 0x155   : > { %v1103_v46 = vmul.f32 %v3512_v44, %v1087_v8  ;;  %v3403_v44 = vpack.c.bf16 %v1507_v43, %v1506_v42  ;;  %v3091_v42 = vld [vmem:[%s1026_s5] ss:$0 sm:$0xff]  ;;  %s3924_s5 = scalar_lea.vmem %s4053_s19, %s3836_s22 }
 0x157   : > { %v1111_v48 = vmul.f32 %v3075_v45, %v1103_v46  ;;  %v1509_v46 = vld [vmem:[%s1009_s26 + $0x38] sm:$0xff] }
 0x158   : > { %v3514_v49 = vpop.eup %3513 }
 0x159   : > { %v3516_v51 = vpop.eup %3515  ;;  %v1119_v52 = vadd.f32 %v3076_v47, %v1111_v48  ;;  %v1221_v53 = vmul.f32 %v3514_v49, %v3768_v14 }
 0x15a   : > { %v1104_v54 = vmul.f32 %v3516_v51, %v3771_v15 }
 0x15b   : > { %3220 = vmatprep.mubr.msk.f32.mxu0 %vm1077_vm0, %v1119_v52  ;;  %v1228_v56 = vmul.f32 %v3079_v50, %v1221_v53  ;;  %v3086_v52 = vld [vmem:[%s1012_s0] ss:$0 sm:$0xff]  ;;  %s3916_s0 = scalar_lea.vmem %s4052_s18, %s3836_s22 }
 0x15c   : > { %v1112_v57 = vmul.f32 %v3075_v45, %v1104_v54  ;;  %v1508_v45 = vld [vmem:[%s1009_s26 + $0x30] sm:$0xff]  ;;  %s3907_s26 = scalar_lea.vmem %s4051_s17, %s3836_s22 }
 0x15d   : > { %v1235_v58 = vadd.f32 %v3080_v55, %v1228_v56 }
 0x15e   : > { %v1120_v59 = vadd.f32 %v3076_v47, %v1112_v57  ;;  %v3406_v47 = vpack.c.bf16 %v1509_v46, %v1508_v45 }
 0x15f   : > { %3232 = vmatmul.mubr.msk.f32.vlgmr.msra.gmra.mrb[0].mxu1 %vm1077_vm0, %v1235_v58 }
 0x160   : > { %3221 = vmatmul.mubr.msk.f32.vlgmr.msra.gmra.mrb[0].mxu0 %vm1077_vm0, %v1120_v59  ;;  %3245 = vmatprep.mubr.msk.f32.mxu1 %vm3588_vm1, %v3589_v34 }
 0x161   : > { %3238 = vmatprep.mubr.msk.f32.mxu0 %vm3588_vm1, %v3589_v34 }
 0x232   : > { %v1309_v60 = vpop.f32.mrb[0].mxu1 }
 0x233   : > { %v3222_v61 = vpop.f32.mrb[0].mxu0  ;;  %v3233_v62 = vpop.f32.mrb[1].mxu1 }
 0x234   : > { %v1197_v63 = vpop.f32.mrb[1].mxu0 }
 0x235   : > { %v3506_v2 = vpack.i.bf16 %v3222_v61, %v1197_v63  ;;  %v3390_v3 = vpack.c.bf16 %v3222_v61, %v1197_v63 }
 0x237   : > { %3507 = vrot.lane.b32.xlu1 %v3506_v2, %s3590_s20  ;;  %3392 = vmatpush3.bf16.xpose.msk.msra.mxu0 %vm3391_vm2, %v3390_v3 }
 0x238   : > { %3408 = vmatprep.subr.bf16.mxu0 %v3587_v21 }
 0x23e   : > { %3239 = vmatmul.mubr.msk.f32.vlgmr.msra.gmra.mrb[2].mxu0 %vm1077_vm0, %v1309_v60 }
 0x23f   : > { %3275 = vmatprep.mubr.msk.f32.mxu0 %vm3588_vm1, %v3589_v34 }
 0x2a9   : > { %v3508_v5 = vpop.permute.xlu1 %3507 }
 0x2aa   : > { %v3510_v6 = vunpack.i.h.bf16 %v3508_v5  ;;  %v3509_v7 = vunpack.i.l.bf16 %v3508_v5 }
 0x2ac   : > { %v3394_v8 = vpack.c.bf16 %v3510_v6, %v3509_v7 }
 0x2ae   : > { %3395 = vmatpush3.bf16.msra.mxu1 %v3394_v8 }
 0x2af   : > { %3396 = vmatprep.subr.bf16.mxu1 %v3587_v21 }
 0x311   : > { %v1388_v9 = vpop.f32.mrb[2].mxu0 }
 0x312   : > { %v1393_v10 = vsel %vm1392_vm3, %v1388_v9, -inf  ;;  %v3240_v11 = vpop.f32.mrb[3].mxu0 }
 0x313   : > { %v1394_v12 = vrot.slane %v1393_v10, 4 }
 0x315   : > { %v1395_v13 = vmax.f32 %v1393_v10, %v1394_v12 }
 0x317   : > { %v1396_v14 = vrot.slane %v1395_v13, 2 }
 0x319   : > { %v1397_v15 = vmax.f32 %v1395_v13, %v1396_v14 }
 0x31b   : > { %v1398_v16 = vrot.slane %v1397_v15, 1 }
 0x31d   : > { %v1399_v17 = vmax.f32 %v1397_v15, %v1398_v16  ;;  %v3090_v15 = vld [vmem:[%s1018_s24] ss:$0 sm:$0xff] }
 0x31f   : > { %v1400_v18 = vsub.f32 %v1388_v9, %v1399_v17 }
 0x321   : > { %v1401_v19 = vmul.f32 1.442695, %v1400_v18  ;;  %v3089_v18 = vld [vmem:[%s1015_s4] ss:$0 sm:$0xff] }
 0x323   : > { %3517 = vpow2.f32 %v1401_v19  ;;  %v1657_v19 = vld [vmem:[%s1023_s27] sm:$0xff] }
 0x32d   : > { %v3518_v20 = vpop.eup %3517 }
 0x32e   : > { %v1403_v22 = vsel %vm1392_vm3, %v3518_v20, 0.0 }
 0x32f   : > { %v1404_v23 = vrot.slane %v1403_v22, 4 }
 0x331   : > { %v1405_v24 = vadd.f32 %v1404_v23, %v1403_v22  ;;  %v1659_v22 = vld [vmem:[%s1023_s27 + $0x10] sm:$0xff] }
 0x333   : > { %v1406_v25 = vrot.slane %v1405_v24, 2 }
 0x335   : > { %v1407_v26 = vadd.f32 %v1406_v25, %v1405_v24  ;;  %v1660_v24 = vld [vmem:[%s1023_s27 + $0x18] sm:$0xff] }
 0x336   : > { %v3412_v25 = vpack.c.bf16 %v1660_v24, %v1659_v22  ;;  %v3111_v22 = vld [vmem:[%s3916_s0 + $0x38] sm:$0xff]  ;;  %v3102_v24 = vld [vmem:[%s3907_s26 + $0x20] sm:$0xff] }
 0x337   : > { %v1408_v27 = vrot.slane %v1407_v26, 1 }
 0x339   : > { %v1409_v28 = vadd.f32 %v1408_v27, %v1407_v26 }
 0x33b   : > { %3519 = vrcp.f32 %v1409_v28 }
 0x345   : > { %v3520_v29 = vpop.eup %3519 }
 0x346   : > { %v1411_v30 = vmul.f32 %v3520_v29, %v3518_v20  ;;  %v1658_v20 = vld [vmem:[%s1023_s27 + $0x8] sm:$0xff]  ;;  %s4084_s27 = sld [smem:[#allocation17_spill]] }
 0x347   : > { %v3409_v23 = vpack.c.bf16 %v1658_v20, %v1657_v19  ;;  %v3110_v20 = vld [vmem:[%s3916_s0 + $0x30] sm:$0xff] }
 0x348   : > { %v1412_v31 = vadd.f32 1e-08, %v1411_v30 }
 0x349   : > { %3410 = vmatpush3.bf16.msra.mxu0 %v3409_v23 }
 0x34a   : > { %v1413_v32 = vsel %vm1392_vm3, %v1412_v31, 0.0  ;;  %3411 = vmatprep.subr.bf16.mxu0 %v3587_v21 }
 0x34b   : > { %1414 = vadd.xlane.f32.xlu0 %v1413_v32 }
 0x34d   : > { %3413 = vmatpush3.bf16.msra.mxu0 %v3412_v25  ;;  %v3103_v25 = vld [vmem:[%s3907_s26 + $0x28] sm:$0xff] }
 0x34e   : > { %3414 = vmatprep.subr.bf16.mxu0 %v3587_v21 }
 0x361   : > { %1498 = vrot.lane.b32.xlu0 %v3762_v4, %s3591_s21  ;;  %v3400_v4 = vpack.c.bf16 %v1505_v41, %v1504_v40 }
 0x3d8   : > { %v1415_v33 = vpop.xlane.xlu0 %1414 }
 0x3d9   : > { %3521 = vrcp.f32 %v1415_v33 }
 0x3dc   : > { %v1499_v48 = vpop.permute.xlu0 %1498 }
 0x3e3   : > { %v3522_v37 = vpop.eup %3521 }
 0x3e4   : > { %v1417_v39 = vmul.f32 %v3522_v37, %v1412_v31 }
 0x3e6   : > { %3246 = vmatmul.mubr.msk.f32.vlgmr.msra.gmra.mrb[2].mxu1 %vm1392_vm3, %v1417_v39 }
 0x3e7   : > { %3398 = vmatpush3.bf16.msra.mxu1 %v3397_v38  ;;  %3264 = vmatprep.mubr.msk.f32.mxu1 %vm3588_vm1, %v3589_v34 }
 0x3e8   : > { %3399 = vmatprep.subr.bf16.mxu1 %v3587_v21 }
 0x3eb   : > { %3401 = vmatpush3.bf16.msra.mxu1 %v3400_v4 }
 0x3ec   : > { %3402 = vmatprep.subr.bf16.mxu1 %v3587_v21 }
 0x3ef   : > { %3404 = vmatpush3.bf16.msra.mxu1 %v3403_v44 }
 0x3f0   : > { %3405 = vmatprep.subr.bf16.mxu1 %v3587_v21 }
 0x3f3   : > { %3407 = vmatpush3.bf16.msra.mxu1 %v3406_v47  ;;  %v3094_v47 = vld [vmem:[%s1034_s25] ss:$0 sm:$0xff] }
 0x4b9   : > { %v1493_v49 = vpop.f32.mrb[2].mxu1 }
 0x4ba   : > { %v1501_v50 = vsel %vm1077_vm0, %v1493_v49, %v1499_v48  ;;  %v3247_v51 = vpop.f32.mrb[3].mxu1  ;;  %v1843_v49 = vld [vmem:[%s3907_s26 + $0x8] sm:$0xff] }
 0x4bb   : > { %3265 = vmatmul.mubr.msk.f32.vlgmr.msra.gmra.mrb[4].mxu1 %vm1517_vm4, %v1501_v50  ;;  %v1844_v50 = vld [vmem:[%s3907_s26 + $0x10] sm:$0xff] }
 0x4bc   : > { %3297 = vmatprep.mubr.msk.f32.mxu1 %vm1077_vm0, %v3746_v0 }
 0x58e   : > { %v1587_v53 = vpop.f32.mrb[4].mxu1 }
 0x58f   : > { %v1588_v54 = vadd.f32 %v3086_v52, %v1587_v53  ;;  %v3266_v55 = vpop.f32.mrb[5].mxu1  ;;  %v1845_v52 = vld [vmem:[%s3907_s26 + $0x18] sm:$0xff] }
 0x590   : > { %v3424_v53 = vpack.c.bf16 %v1845_v52, %v1844_v50  ;;  %v1928_v55 = vld [vmem:[%s3916_s0 + $0x8] sm:$0xff] }
 0x591   : > { %1598 = vrot.lane.b32.xlu1 %v1588_v54, %s3591_s21  ;;  %v3088_v56 = vmul.f32 -1.442695, %v1588_v54 }
 0x593   : > { %3523 = vpow2.f32 %v3088_v56 }
 0x59d   : > { %v3524_v57 = vpop.eup %3523 }
 0x59e   : > { %v1594_v58 = vadd.f32 1.0, %v3524_v57  ;;  %v1929_v57 = vld [vmem:[%s3916_s0 + $0x10] sm:$0xff] }
 0x5a0   : > { %3525 = vrcp.f32 %v1594_v58  ;;  %v1930_v58 = vld [vmem:[%s3916_s0 + $0x18] sm:$0xff] }
 0x5aa   : > { %v3526_v59 = vpop.eup %3525 }
 0x5ab   : > { %v1608_v3 = vsub.f32 1.0, %v3526_v59  ;;  %v1614_v6 = vmul.f32 %v3526_v59, %v1499_v48  ;;  %v1842_v48 = vld [vmem:[%s3907_s26] sm:$0xff] }
 0x5ac   : > { %v3420_v51 = vpack.c.bf16 %v1843_v49, %v1842_v48 }
 0x5ae   : > { %3421 = vmatprep.subr.bf16.mxu1 %v3420_v51 }
 0x5af   : > { %3423 = vmatpush3.bf16.msra.mxu1 %v3420_v51 }
 0x5b0   : > { %3425 = vmatprep.subr.bf16.mxu1 %v3424_v53 }
 0x5b3   : > { %3427 = vmatpush3.bf16.msra.mxu1 %v3424_v53 }
 0x5b4   : > { %3434 = vmatprep.subr.bf16.mxu1 %v3587_v21 }
 0x5b6   : > { %3298 = vmatmul.mubr.msk.f32.vlgmr.msra.gmra.mrb[6].mxu1 %vm1077_vm0, %v3749_v1 }
 0x5b7   : > { %3319 = vmatprep.mubr.msk.f32.mxu1 %vm3588_vm1, %v3589_v34 }
 0x603   : > { %v1599_v60 = vpop.permute.xlu1 %1598 }
 0x604   : > { %v1601_v61 = vmul.f32 %v3526_v59, %v1599_v60  ;;  %v2006_v60 = vld [vmem:[%s3924_s5] sm:$0xff] }
 0x606   : > { %1603 = vrot.lane.b32.xlu1 %v1601_v61, %s3592_s23  ;;  %s1031_s23 = scalar_lea.vmem %s4048_s14, %s3781_s29  ;;  %v2007_v61 = vld [vmem:[%s3924_s5 + $0x8] sm:$0xff]  ;;  %s4086_s29 = sld [smem:[#allocation15_spill]] }
 0x607   : > { %v1744_v36 = vld [vmem:[%s1031_s23] sm:$0xff]  ;;  %v1745_v37 = vld [vmem:[%s1031_s23 + $0x8] sm:$0xff]  ;;  %v1746_v40 = vld [vmem:[%s1031_s23 + $0x10] sm:$0xff] }
 0x608   : > { %v3415_v38 = vpack.c.bf16 %v1745_v37, %v1744_v36  ;;  %v1747_v41 = vld [vmem:[%s1031_s23 + $0x18] sm:$0xff]  ;;  %s3064_s23 = sshll.u32 %s4102_s28, 3  ;;  %v3114_v36 = vld [vmem:[%s3924_s5 + $0x28] sm:$0xff] }
 0x609   : > { %v3418_v4 = vpack.c.bf16 %v1747_v41, %v1746_v40  ;;  %s1038_s25 = scalar_lea.vmem %s4050_s16, %s3064_s23  ;;  %v3115_v40 = vld [vmem:[%s3924_s5 + $0x30] sm:$0xff]  ;;  %v3116_v41 = vld [vmem:[%s3924_s5 + $0x38] sm:$0xff] }
 0x60c   : > { %s1056_s1 = scalar_lea.vmem %s4086_s29, %s4102_s28 }
 0x678   : > { %v1604_v62 = vpop.permute.xlu1 %1603 }
 0x679   : > { %v1606_v63 = vadd.f32 %v1604_v62, %v1588_v54  ;;  %v1927_v54 = vld [vmem:[%s3916_s0] sm:$0xff]  ;;  %v3432_v62 = vpack.c.bf16 %v1930_v58, %v1929_v57 }
 0x67a   : > { %v3429_v56 = vpack.c.bf16 %v1928_v55, %v1927_v54 }
 0x67b   : > { %3527 = vtanh.f32 %v1606_v63 }
 0x685   : > { %v3528_v2 = vpop.eup %3527 }
 0x686   : > { %1610 = vrot.lane.b32.xlu1 %v3528_v2, %s3590_s20  ;;  %v1836_v2 = vld [vmem:[%s1038_s25] sm:$0xff] }
 0x6f8   : > { %v1611_v5 = vpop.permute.xlu1 %1610 }
 0x6f9   : > { %v1613_v7 = vmul.f32 %v1611_v5, %v1608_v3  ;;  %v3435_v3 = vpack.c.bf16 %v2007_v61, %v2006_v60  ;;  %v2008_v5 = vld [vmem:[%s3924_s5 + $0x10] sm:$0xff] }
 0x6fb   : > { %v3857_v8 = vadd.f32 %v1614_v6, %v1613_v7  ;;  %v2009_v6 = vld [vmem:[%s3924_s5 + $0x18] sm:$0xff]  ;;  %3436 = vmatpush3.bf16.msra.mxu1 %v3435_v3 }
 0x6fc   : > { %v3438_v7 = vpack.c.bf16 %v2009_v6, %v2008_v5  ;;  %3437 = vmatprep.subr.bf16.mxu1 %v3587_v21 }
 0x6fd   : > { %1619 = vrot.lane.b32.xlu0 %v3857_v8, %s3590_s20 }
 0x6ff   : > { %3439 = vmatpush3.bf16.msra.mxu1 %v3438_v7 }
 0x700   : > { %3448 = vmatprep.subr.bf16.mxu1 %v3587_v21 }
 0x76f   : > { %v1620_v9 = vpop.permute.xlu0 %1619 }
 0x770   : > { %v1622_v10 = vsel %vm1077_vm0, %v1620_v9, 0.0 }
 0x771   : > { %1623 = vadd.xlane.f32.xlu1 %v1622_v10 }
 0x782   : > { %1653 = vrot.lane.b32.xlu1 %v3090_v15, %s3591_s21  ;;  %v3299_v15 = vpop.f32.mrb[6].mxu1 }
 0x7fe   : > { %v1624_v11 = vpop.xlane.xlu1 %1623 }
 0x7ff   : > { %v1625_v12 = vmul.f32 0.03125, %v1624_v11 }
 0x801   : > { %v1626_v13 = vsub.f32 %v3857_v8, %v1625_v12 }
 0x802   : > { %v1654_v32 = vpop.permute.xlu1 %1653 }
 0x803   : > { %v1627_v14 = vmul.f32 %v1626_v13, %v1626_v13 }
 0x805   : > { %1629 = vrot.lane.b32.xlu0 %v1627_v14, %s3590_s20 }
 0x877   : > { %v1630_v16 = vpop.permute.xlu0 %1629 }
 0x878   : > { %v1632_v17 = vsel %vm1077_vm0, %v1630_v16, 0.0  ;;  %v1918_v16 = vpop.f32.mrb[7].mxu1 }
 0x879   : > { %1633 = vadd.xlane.f32.xlu0 %v1632_v17  ;;  %v3108_v17 = vld [vmem:[%s3916_s0 + $0x20] sm:$0xff] }
 0x88f   : > { %1644 = vrot.lane.b32.xlu0 %v3089_v18, %s3591_s21  ;;  %v3109_v18 = vld [vmem:[%s3916_s0 + $0x28] sm:$0xff] }
 0x890   : > { %v3449_v19 = vpack.c.bf16 %v3109_v18, %v3108_v17 }
 0x893   : > { %1832 = vrot.lane.b32.xlu0 %v3094_v47, %s3591_s21 }
 0x906   : > { %v1634_v26 = vpop.xlane.xlu0 %1633 }
 0x907   : > { %v1635_v27 = vmul.f32 0.03125, %v1634_v26  ;;  %v3440_v26 = vpack.c.bf16 %v3103_v25, %v3102_v24 }
 0x909   : > { %v1636_v28 = vadd.f32 1e-05, %v1635_v27 }
 0x90a   : > { %v1645_v30 = vpop.permute.xlu0 %1644 }
 0x90b   : > { %3529 = vrsqrt.f32 %v1636_v28 }
 0x90e   : > { %v1833_v10 = vpop.permute.xlu0 %1832 }
 0x915   : > { %v3530_v29 = vpop.eup %3529 }
 0x916   : > { %v1638_v31 = vmul.f32 %v3530_v29, %v1626_v13  ;;  %v3104_v29 = vld [vmem:[%s3907_s26 + $0x30] sm:$0xff] }
 0x918   : > { %v1647_v33 = vmul.f32 %v1645_v30, %v1638_v31  ;;  %v3105_v30 = vld [vmem:[%s3907_s26 + $0x38] sm:$0xff] }
 0x91a   : > { %v1656_v35 = vadd.f32 %v1654_v32, %v1647_v33  ;;  %v3444_v33 = vpack.c.bf16 %v3105_v30, %v3104_v29 }
 0x91c   : > { %1669 = vrot.lane.b32.xlu1 %v1656_v35, %s3590_s20  ;;  %v3113_v35 = vld [vmem:[%s3924_s5 + $0x20] sm:$0xff] }
 0x98e   : > { %v1670_v39 = vpop.permute.xlu1 %1669 }
 0x98f   : > { %3276 = vmatmul.mubr.msk.f32.vlgmr.msra.gmra.mrb[4].mxu0 %vm1077_vm0, %v1670_v39  ;;  %v3455_v39 = vpack.c.bf16 %v3114_v36, %v3113_v35 }
 0x990   : > { %3416 = vmatpush3.bf16.msra.mxu0 %v3415_v38  ;;  %3286 = vmatprep.mubr.msk.f32.mxu0 %vm3588_vm1, %v3589_v34 }
 0x991   : > { %3417 = vmatprep.subr.bf16.mxu0 %v3587_v21 }
 0x994   : > { %3419 = vmatpush3.bf16.msra.mxu0 %v3418_v4 }
 0x995   : > { %3428 = vmatprep.subr.bf16.mxu0 %v3587_v21 }
 0xa62   : > { %v1739_v43 = vpop.f32.mrb[4].mxu0 }
 0xa63   : > { %v1740_v44 = vadd.f32 %v3091_v42, %v1739_v43  ;;  %v3277_v45 = vpop.f32.mrb[5].mxu0 }
 0xa65   : > { %v1743_v46 = vmax.f32 %v1740_v44, 0.0 }
 0xa67   : > { %3287 = vmatmul.mubr.msk.f32.vlgmr.msra.gmra.mrb[6].mxu0 %vm1077_vm0, %v1743_v46 }
 0xa68   : > { %3308 = vmatprep.mubr.msk.f32.mxu0 %vm3588_vm1, %v3589_v34  ;;  %3430 = vmatpush3.bf16.msra.mxu0 %v3429_v56 }
 0xa69   : > { %3431 = vmatprep.subr.bf16.mxu0 %v3587_v21 }
 0xa6c   : > { %3433 = vmatpush3.bf16.msra.mxu0 %v3432_v62 }
 0xb3a   : > { %v1817_v59 = vpop.f32.mrb[6].mxu0 }
 0xb3b   : > { %1822 = vrot.lane.b32.xlu1 %v1817_v59, %s3591_s21  ;;  %v3288_v63 = vpop.f32.mrb[7].mxu0 }
 0xb3f   : > { %1838 = vrot.lane.b32.xlu1 %v1836_v2, %s3591_s21  ;;  %s3073_s21 = sshll.u32 %s4102_s28, 2 }
 0xbad   : > { %v1823_v9 = vpop.permute.xlu1 %1822 }
 0xbae   : > { %v1825_v11 = vadd.f32 %v1823_v9, %v3857_v8  ;;  %v3452_v8 = vpack.c.bf16 %v3111_v22, %v3110_v20 }
 0xbb0   : > { %v1835_v12 = vadd.f32 %v1833_v10, %v1825_v11 }
 0xbb1   : > { %v1839_v13 = vpop.permute.xlu1 %1838 }
 0xbb2   : > { %v1841_v14 = vadd.f32 %v1839_v13, %v1835_v12 }
 0xbb4   : > { %1932 = vrot.lane.b32.xlu0 %v1841_v14, %s3590_s20  ;;  %s3072_s20 = sshll.u32 %s4100_s3, 1  ;;  %s4085_s3 = sld [smem:[#allocation7_spill]] }
 0xbb5   : > { %s1070_s22 = sadd.s32 %s3073_s21, %s3072_s20 }
 0xbb6   : > { %s3074_s4 = sshll.u32 %s1070_s22, 3 }
 0xbb7   : > { %s1072_s30 = scalar_lea.vmem %s4084_s27, %s3074_s4 }
 0xbba   : > { %s1063_s25 = scalar_lea.vmem %s4087_s6, %s4085_s3 }
 0xc26   : > { %v1933_v23 = vpop.permute.xlu0 %1932 }
 0xc27   : > { %3309 = vmatmul.mubr.msk.f32.vlgmr.msra.gmra.mrb[8].mxu0 %vm1077_vm0, %v1933_v23  ;;  %3320 = vmatmul.mubr.msk.f32.vlgmr.msra.gmra.mrb[8].mxu1 %vm1077_vm0, %v1933_v23 }
 0xc28   : > { %3450 = vmatpush3.bf16.msra.mxu1 %v3449_v19  ;;  %3346 = vmatprep.mubr.msk.f32.mxu1 %vm3588_vm1, %v3589_v34 }
 0xc29   : > { %3451 = vmatprep.subr.bf16.mxu1 %v3587_v21  ;;  %3324 = vmatprep.mubr.msk.f32.mxu0 %vm1392_vm3, %v1918_v16 }
 0xc2c   : > { %3453 = vmatpush3.bf16.msra.mxu1 %v3452_v8 }
 0xc2f   : > { %3347 = vmatmul.mubr.msk.f32.vlgmr.msra.gmra.mrb[10].mxu1 %vm1077_vm0, %v1933_v23 }
 0xcfa   : > { %v2002_v27 = vpop.f32.mrb[8].mxu0  ;;  %v2076_v28 = vpop.f32.mrb[8].mxu1 }
 0xcfb   : > { %v3310_v31 = vpop.f32.mrb[9].mxu0  ;;  %v3321_v32 = vpop.f32.mrb[9].mxu1  ;;  %3322 = vmatprep.subr.msk.mxu0 %vm1392_vm3, %v2002_v27 }
 0xcfc   : > { %3323 = vmatpush3.xpose.msk.msra.mxu0 %vm1392_vm3, %v2002_v27 }
 0xcfd   : > { %3441 = vmatprep.subr.bf16.mxu0 %v3440_v26 }
 0xcff   : > { %3325 = vmatmul.mubr.msk.f32.vlgmr.msra.gmra.mrb[10].mxu0 %vm1392_vm3, %v3299_v15 }
 0xd00   : > { %3443 = vmatpush3.bf16.msra.mxu0 %v3440_v26  ;;  %3335 = vmatprep.mubr.msk.f32.mxu0 %vm1077_vm0, %v3746_v0  ;;  %v3458_v0 = vpack.c.bf16 %v3116_v41, %v3115_v40 }
 0xd01   : > { %3445 = vmatprep.subr.bf16.mxu0 %v3444_v33 }
 0xd02   : > { %v2351_v37 = vpop.f32.mrb[10].mxu1 }
 0xd03   : > { %v3348_v38 = vpop.f32.mrb[11].mxu1  ;;  %3360 = vmatprep.subr.msk.mxu1 %vm1392_vm3, %v2351_v37 }
 0xd04   : > { %3361 = vmatpush3.xpose.msk.msra.mxu1 %vm1392_vm3, %v2351_v37  ;;  %3447 = vmatpush3.bf16.msra.mxu0 %v3444_v33 }
 0xd05   : > { %3454 = vmatprep.subr.bf16.mxu0 %v3587_v21  ;;  %3365 = vmatprep.subr.mxu1 %v3589_v34 }
 0xd07   : > { %3336 = vmatmul.mubr.msk.f32.vlgmr.msra.gmra.mrb[12].mxu0 %vm1077_vm0, %v3749_v1 }
 0xd08   : > { %3456 = vmatpush3.bf16.msra.mxu0 %v3455_v39  ;;  %3357 = vmatprep.mubr.msk.f32.mxu0 %vm3588_vm1, %v3589_v34 }
 0xd09   : > { %3457 = vmatprep.subr.bf16.mxu0 %v3587_v21 }
 0xd0c   : > { %3459 = vmatpush3.bf16.msra.mxu0 %v3458_v0 }
 0xd0d   : > { %3370 = vmatprep.subr.mxu0 %v3589_v34 }
 0xd0f   : > { %3358 = vmatmul.mubr.msk.f32.vlgmr.msra.gmra.mrb[14].mxu0 %vm1077_vm0, %v1933_v23 }
 0xd10   : > { %3371 = vmatpush3.msra.mxu0 %v2076_v28  ;;  %3372 = vmatprep.mubr.msk.f32.mxu0 %vm3588_vm1, %v3589_v34 }
 0xdd2   : > { %v3326_v4 = vpop.f32.mrb[10].mxu0 }
 0xdd3   : > { %v2155_v42 = vpop.f32.mrb[11].mxu0  ;;  %v2168_v1 = vsel %vm2164_vm5, %v3326_v4, -inf }
 0xdd4   : > { %2169 = vmax.xlane.f32.xlu0 %v2168_v1  ;;  %v2165_v43 = vsel %vm2164_vm5, %v2155_v42, -inf }
 0xdd5   : > { %2166 = vmax.xlane.f32.xlu1 %v2165_v43 }
 0xdda   : > { %v3337_v44 = vpop.f32.mrb[12].mxu0 }
 0xddb   : > { %v2271_v21 = vpop.f32.mrb[13].mxu0 }
 0xddc   : > { %3362 = vmatprep.mubr.msk.f32.mxu1 %vm1392_vm3, %v2271_v21 }
 0xddd   : > { %3363 = vmatmul.mubr.msk.f32.vlgmr.msra.gmra.mrb[12].mxu1 %vm1392_vm3, %v3337_v44 }
 0xdde   : > { %3367 = vmatprep.mubr.msk.f32.mxu1 %vm3588_vm1, %v3589_v34 }
 0xde2   : > { %v2426_v45 = vpop.f32.mrb[14].mxu0 }
 0xde3   : > { %v3359_v46 = vpop.f32.mrb[15].mxu0  ;;  %3366 = vmatpush3.msra.mxu1 %v2426_v45 }
 0xde4   : > { %v2694_v46 = vld [vmem:[%s1056_s1] sm:$0x1] }
 0xe61   : > { %v2170_v52 = vpop.xlane.xlu0 %2169 }
 0xe62   : > { %v2167_v47 = vpop.xlane.xlu1 %2166  ;;  %v2172_v53 = vsub.f32 %v3326_v4, %v2170_v52 }
 0xe63   : > { %v2171_v48 = vsub.f32 %v2155_v42, %v2167_v47 }
 0xe64   : > { %v2175_v54 = vmul.f32 1.442695, %v2172_v53 }
 0xe65   : > { %v2173_v49 = vmul.f32 1.442695, %v2171_v48 }
 0xe67   : > { %3531 = vpow2.f32 %v2173_v49 }
 0xe68   : > { %3533 = vpow2.f32 %v2175_v54 }
 0xe71   : > { %v3532_v50 = vpop.eup %3531 }
 0xe72   : > { %v2177_v51 = vsel %vm2164_vm5, %v3532_v50, 0.0  ;;  %v3534_v58 = vpop.eup %3533 }
 0xe73   : > { %2178 = vadd.xlane.f32.xlu1 %v2177_v51  ;;  %v2180_v59 = vsel %vm2164_vm5, %v3534_v58, 0.0 }
 0xeb0   : > { %v3364_v55 = vpop.f32.mrb[12].mxu1 }
 0xeb1   : > { %v2505_v56 = vpop.f32.mrb[13].mxu1  ;;  %v2517_v34 = vsel %vm2164_vm5, %v3364_v55, -inf }
 0xeb2   : > { %v2514_v57 = vsel %vm2164_vm5, %v2505_v56, -inf }
 0xeb3   : > { %2515 = vmax.xlane.f32.xlu0 %v2514_v57 }
 0xeb7   : > { %2518 = vmax.xlane.f32.xlu0 %v2517_v34 }
 0xebb   : > { %2181 = vadd.xlane.f32.xlu0 %v2180_v59 }
 0xf00   : > { %v2179_v62 = vpop.xlane.xlu1 %2178 }
 0xf40   : > { %v2516_v60 = vpop.xlane.xlu0 %2515 }
 0xf41   : > { %v2520_v61 = vsub.f32 %v2505_v56, %v2516_v60 }
 0xf43   : > { %v2522_v63 = vmul.f32 1.442695, %v2520_v61 }
 0xf44   : > { %v2519_v2 = vpop.xlane.xlu0 %2518 }
 0xf45   : > { %3535 = vpow2.f32 %v2522_v63  ;;  %v2521_v3 = vsub.f32 %v3364_v55, %v2519_v2 }
 0xf46   : > { %3537 = vrcp.f32 %v2179_v62 }
 0xf47   : > { %v2524_v5 = vmul.f32 1.442695, %v2521_v3 }
 0xf48   : > { %v2182_v6 = vpop.xlane.xlu0 %2181 }
 0xf49   : > { %3539 = vpow2.f32 %v2524_v5 }
 0xf4a   : > { %3541 = vrcp.f32 %v2182_v6 }
 0xf4f   : > { %v3536_v7 = vpop.eup %3535 }
 0xf50   : > { %v3538_v9 = vpop.eup %3537  ;;  %v2526_v10 = vsel %vm2164_vm5, %v3536_v7, 0.0 }
 0xf51   : > { %2527 = vadd.xlane.f32.xlu1 %v2526_v10  ;;  %v2184_v12 = vmul.f32 %v3538_v9, %v3532_v50 }
 0xf53   : > { %v3540_v11 = vpop.eup %3539  ;;  %v2189_v16 = vsel %vm2164_vm5, %v2184_v12, 0.0 }
 0xf54   : > { %v3542_v13 = vpop.eup %3541  ;;  %v2529_v14 = vsel %vm2164_vm5, %v3540_v11, 0.0 }
 0xf55   : > { %v2186_v15 = vmul.f32 %v3542_v13, %v3534_v58  ;;  %2530 = vadd.xlane.f32.xlu0 %v2529_v14 }
 0xf57   : > { %v2190_v17 = vsel %vm2164_vm5, %v2186_v15, 0.0 }
 0xf58   : > { %v2191_v18 = vadd.f32 %v2190_v17, %v2189_v16 }
 0xf5a   : > { %v2192_v19 = vrot.slane %v2191_v18, 4 }
 0xf5c   : > { %v2193_v20 = vadd.f32 %v2192_v19, %v2191_v18 }
 0xf5e   : > { %v2194_v22 = vrot.slane %v2193_v20, 2 }
 0xf60   : > { %v2195_v23 = vadd.f32 %v2194_v22, %v2193_v20 }
 0xf62   : > { %v2196_v8 = vrot.slane %v2195_v23, 1 }
 0xf64   : > { %v2197_v24 = vadd.f32 %v2196_v8, %v2195_v23 }
 0xf66   : > { %v2199_v25 = vmul.f32 0.0625, %v2197_v24 }
 0xf68   : > { %3373 = vmatmul.mubr.msk.f32.vlgmr.msra.gmra.mrb[16].mxu0 %vm2164_vm5, %v2199_v25 }
 0xfde   : > { %v2528_v26 = vpop.xlane.xlu1 %2527 }
 0xfdf   : > { %3543 = vrcp.f32 %v2528_v26 }
 0xfe2   : > { %v2531_v27 = vpop.xlane.xlu0 %2530 }
 0xfe3   : > { %3545 = vrcp.f32 %v2531_v27 }
 0xfe9   : > { %v3544_v28 = vpop.eup %3543 }
 0xfea   : > { %v2533_v29 = vmul.f32 %v3544_v28, %v3536_v7 }
 0xfec   : > { %v2536_v30 = vadd.f32 %v2533_v29, %v2184_v12  ;;  %v2538_v35 = vsel %vm2164_vm5, %v2533_v29, 0.0 }
 0xfed   : > { %v3546_v31 = vpop.eup %3545 }
 0xfee   : > { %v2698_v32 = vmul.f32 0.5, %v2536_v30  ;;  %v2535_v33 = vmul.f32 %v3546_v31, %v3540_v11 }
 0xff0   : > { %2700 = vst.msk [vmem:[%s1072_s30] sm:$0xff] %vm2164_vm5, %v2698_v32  ;;  %v2537_v36 = vadd.f32 %v2535_v33, %v2186_v15  ;;  %v2539_v37 = vsel %vm2164_vm5, %v2535_v33, 0.0 }
 0xff1   : > { %v2540_v38 = vadd.f32 %v2539_v37, %v2538_v35 }
 0xff2   : > { %v2699_v39 = vmul.f32 0.5, %v2537_v36 }
 0xff3   : > { %v2541_v40 = vrot.slane %v2540_v38, 4 }
 0xff4   : > { %2701 = vst.msk [vmem:[%s1072_s30 + $0x8] sm:$0xff] %vm2164_vm5, %v2699_v39 }
 0xff5   : > { %v2542_v41 = vadd.f32 %v2541_v40, %v2540_v38 }
 0xff7   : > { %v2543_v0 = vrot.slane %v2542_v41, 2 }
 0xff9   : > { %v2544_v4 = vadd.f32 %v2543_v0, %v2542_v41 }
 0xffb   : > { %v2545_v42 = vrot.slane %v2544_v4, 1 }
 0xffd   : > { %v2546_v1 = vadd.f32 %v2545_v42, %v2544_v4 }
 0xfff   : > { %v2547_v43 = vmul.f32 0.0625, %v2546_v1 }
0x1001   : > { %3368 = vmatmul.mubr.msk.f32.vlgmr.msra.gmra.mrb[14].mxu1 %vm2164_vm5, %v2547_v43 }
0x103b   : > { %v2690_v44 = vpop.f32.mrb[16].mxu0 }
0x103c   : > { %v3374_v21 = vpop.f32.mrb[17].mxu0 }
0x10d4   : > { %v2617_v45 = vpop.f32.mrb[14].mxu1 }
0x10d5   : > { %v2691_v47 = vadd.f32 %v2690_v44, %v2617_v45  ;;  %v3369_v48 = vpop.f32.mrb[15].mxu1 }
0x10d7   : > { %v2695_v49 = vadd.f32 %v2694_v46, %v2691_v47 }
0x10d9   : > { %2697 = vst.msk [vmem:[%s1063_s25] sm:$0x1] %vm2696_vm6, %v2695_v49 }
0x10da PF: > { %s4088_s20 = sld [smem:[#allocation4_spill]]  ;;  %s4089_s3 = sld [smem:[#allocation2_spill]] }
0x10db   : > { %s4090_s28 = sld [smem:[#allocation3_spill]]  ;;  %s4091_s29 = sld [smem:[#allocation5_spill]] }
0x10dc   : > { %s4092_s30 = sld [smem:[#allocation6_spill]] }
0x10e0   : > { %s33_s4 = sadd.s32 1, %s4088_s20  }
0x10e1   : > { %p30_p7 = scmp.ge.s32.totalorder %s33_s4, 8  }
0x10e3   :  { %32 = sbr.rel (!%p30_p7) target bundleno = 11 (0xb), region = 209 }

</bundles_post_ra>
